<compile_context>
chip_gen: v7x
topology: tpu7x:2x2x1
jax: 0.10.0
libtpu: 0.0.40
codegen_flags: <defaults>
</compile_context>

<pallas_src>
import jax
import jax.numpy as jnp
from jax import lax
from jax.experimental import pallas as pl
from jax.experimental.pallas import tpu as pltpu

N_IN = 3456   # Cin of Conv2d(3456, 144, kernel_size=(1, 1))
N_OUT = 144   # Cout


def conv1x1_kernel(x_ref, w_ref, b_ref, o_ref):
    # x_ref: [1, Cin], w_ref: [Cout, Cin], b_ref: [1, Cout], o_ref: [1, Cout]
    # Contract over Cin (lane axis for both operands -> no transpose needed).
    o_ref[...] = (
        lax.dot_general(
            x_ref[...],
            w_ref[...],
            dimension_numbers=(((1,), (1,)), ((), ())),
            preferred_element_type=jnp.float32,
        )
        + b_ref[...]
    ).astype(o_ref.dtype)


def conv2d_1x1(x_nchw, weight, bias):
    """x_nchw: [N, Cin, 1, 1], weight: [Cout, Cin, 1, 1], bias: [Cout]."""
    n, cin, h, w = x_nchw.shape
    cout = weight.shape[0]
    assert (h, w) == (1, 1)

    m = n * h * w
    x2d = x_nchw.reshape(m, cin)          # [M, Cin]   (no pad)
    w2d = weight.reshape(cout, cin)       # [Cout, Cin] (no transpose)
    b2d = bias.reshape(1, cout)           # [1, Cout]

    out = pl.pallas_call(
        conv1x1_kernel,
        out_shape=jax.ShapeDtypeStruct((m, cout), x_nchw.dtype),
        # Single grid step: every block is the full array (legal: block shape
        # equals the full array dims, so the (8,128) divisibility rule is
        # satisfied trivially).
        grid_spec=pltpu.PrefetchScalarGridSpec(
            num_scalar_prefetch=0,
            grid=(1,),
            in_specs=[
                pl.BlockSpec((m, cin), lambda k: (0, 0)),      # X (full)
                pl.BlockSpec((cout, cin), lambda k: (0, 0)),   # W (full)
                pl.BlockSpec((1, cout), lambda k: (0, 0)),     # bias (full)
            ],
            out_specs=pl.BlockSpec((m, cout), lambda k: (0, 0)),
        ),
        compiler_params=pltpu.CompilerParams(
            dimension_semantics=("arbitrary",),
        ),
    )(x2d, w2d, b2d)

    # Back to NCHW [N, Cout, 1, 1].
    return out.reshape(n, h, w, cout).transpose(0, 3, 1, 2)


if __name__ == "__main__":
    key = jax.random.PRNGKey(0)
    kx, kw, kb = jax.random.split(key, 3)

    # Shapes implied by the module's forward pass.
    x657 = jax.random.normal(kx, (1, N_IN, 1, 1), dtype=jnp.float32)
    weight = jax.random.normal(kw, (N_OUT, N_IN, 1, 1), dtype=jnp.float32) * 0.02
    bias = jax.random.normal(kb, (N_OUT,), dtype=jnp.float32) * 0.02

    out = conv2d_1x1(x657, weight, bias)
    out = jax.block_until_ready(out)

    # Reference check (plain JAX): 1x1 conv == matmul + bias.
    ref = (x657.reshape(1, N_IN) @ weight.reshape(N_OUT, N_IN).T + bias).reshape(
        1, N_OUT, 1, 1
    )
    assert out.shape == (1, N_OUT, 1, 1), out.shape
    assert jnp.allclose(out, ref, atol=1e-4, rtol=1e-4)

    print("KERNEL_OK")
</pallas_src>

<mosaic_0001>
module attributes {stable_mosaic.version = 11 : i64} {
  func.func @conv1x1_kernel(%arg0: i32, %arg1: memref<1x3456xf32, #tpu.memory_space<vmem>>, %arg2: memref<144x3456xf32, #tpu.memory_space<vmem>>, %arg3: memref<1x144xf32, #tpu.memory_space<vmem>>, %arg4: memref<1x144xf32, #tpu.memory_space<vmem>>) attributes {dimension_semantics = [#tpu.dimension_semantics<arbitrary>], iteration_bounds = array<i64: 1>, scalar_prefetch = 0 : i64, scratch_operands = 0 : i64, tpu.core_type = #tpu.core_type<tc>, window_params = [{pipeline_mode = #tpu.pipeline_mode<synchronous>, transform_indices = @transform_0, window_bounds = array<i64: 1, 3456>}, {pipeline_mode = #tpu.pipeline_mode<synchronous>, transform_indices = @transform_1, window_bounds = array<i64: 144, 3456>}, {pipeline_mode = #tpu.pipeline_mode<synchronous>, transform_indices = @transform_2, window_bounds = array<i64: 1, 144>}, {pipeline_mode = #tpu.pipeline_mode<synchronous>, transform_indices = @transform_3, window_bounds = array<i64: 1, 144>}]} {
    %c0 = arith.constant 0 : index
    %c0_0 = arith.constant 0 : index
    %0 = vector.load %arg1[%c0, %c0_0] : memref<1x3456xf32, #tpu.memory_space<vmem>>, vector<1x3456xf32>
    %c0_1 = arith.constant 0 : index
    %c0_2 = arith.constant 0 : index
    %1 = vector.load %arg2[%c0_1, %c0_2] : memref<144x3456xf32, #tpu.memory_space<vmem>>, vector<144x3456xf32>
    %cst = arith.constant dense<0.000000e+00> : vector<1x144xf32>
    %2 = tpu.matmul %0, %1, %cst {dimension_numbers = #tpu.dot_dimension_numbers<[1], [1], [0], [0], [0, 0, 1, 0], [], []>} : vector<1x3456xf32>, vector<144x3456xf32>, vector<1x144xf32> -> vector<1x144xf32>
    %c0_3 = arith.constant 0 : index
    %c0_4 = arith.constant 0 : index
    %3 = vector.load %arg3[%c0_3, %c0_4] : memref<1x144xf32, #tpu.memory_space<vmem>>, vector<1x144xf32>
    %4 = arith.addf %2, %3 : vector<1x144xf32>
    %c0_5 = arith.constant 0 : index
    %c0_6 = arith.constant 0 : index
    %5 = vector.load %arg4[%c0_5, %c0_6] : memref<1x144xf32, #tpu.memory_space<vmem>>, vector<1x144xf32>
    tpu.vector_store %arg4[%c0_5, %c0_6], %4 {strides = array<i32>} : memref<1x144xf32, #tpu.memory_space<vmem>>, vector<1x144xf32>,
    return
  }
  func.func @transform_0(%arg0: i32) -> (i32, i32) {
    %c0_i32 = arith.constant 0 : i32
    %c0_i32_0 = arith.constant 0 : i32
    %c0_i32_1 = arith.constant 0 : i32
    return %c0_i32, %c0_i32_0 : i32, i32
  }
  func.func @transform_1(%arg0: i32) -> (i32, i32) {
    %c0_i32 = arith.constant 0 : i32
    %c0_i32_0 = arith.constant 0 : i32
    %c0_i32_1 = arith.constant 0 : i32
    return %c0_i32, %c0_i32_0 : i32, i32
  }
  func.func @transform_2(%arg0: i32) -> (i32, i32) {
    %c0_i32 = arith.constant 0 : i32
    %c0_i32_0 = arith.constant 0 : i32
    %c0_i32_1 = arith.constant 0 : i32
    return %c0_i32, %c0_i32_0 : i32, i32
  }
  func.func @transform_3(%arg0: i32) -> (i32, i32) {
    %c0_i32 = arith.constant 0 : i32
    %c0_i32_0 = arith.constant 0 : i32
    %c0_i32_1 = arith.constant 0 : i32
    return %c0_i32, %c0_i32_0 : i32, i32
  }
}

</mosaic_0001>

<bundles_post_ra>
// kernel: tpu_custom_call.1
= control target key start
LH: loop header
LB: loop body
LE: loop exit
PB: predicated region body
PF: predicated region fallthrough
CT: control target
= control target key end

     0   :  { %8 = vsyncpa [#allocation3], 0  ;;  %s2534_s0 = inlined_call_operand.hbm [shape: f32[1,3456], index: 0, kind: input, shape index: {}]   ;;  %s2535_s1 = inlined_call_operand.hbm [shape: f32[144,3456], index: 1, kind: input, shape index: {}]   ;;  %s2536_s2 = inlined_call_operand.hbm [shape: f32[1,144], index: 2, kind: input, shape index: {}]   ;;  %s2537_s3 = inlined_call_operand.hbm [shape: f32[1,144], index: 3, kind: output, shape index: {}]  }
   0x1   :  { %9 = vsyncpa [#allocation6], 0 }
   0x2   :  { %10 = vsyncpa [#allocation4], 0  ;;  %s2355_s12 = smov [#allocation5]   ;;  %s2261_s16 = scalar_lea.hbm %s2535_s1, 62208 }
   0x3   :  { %s26_s13 = sshll.u32 %s2355_s12, 4  ;;  %p2262_p0 = scmp.ne.s32.totalorder %s2535_s1, %s2261_s16  ;;  %s27_s13 = int_to_ptr.vmem [resolvable:$true] %s26_s13 }
   0x4   :  { %p2265_p1 = scmp.lt.u32.totalorder %s2261_s16, %s2535_s1 }
   0x6   :  { %p2267_p2 = pnand %p2265_p1, %p2262_p0 }
   0x8   :  { %2270 = shalt.err (!%p2267_p2)
}
   0x9   :  { %s2271_s21 = scalar_lea.vmem %s27_s13, 62208  ;;  %p2276_p4 = scmp.lt.s32.totalorder %s27_s13, %s27_s13 }
   0xa   :  { %p2272_p3 = scmp.ne.s32.totalorder %s27_s13, %s2271_s21  ;;  %p2277_p5 = scmp.lt.s32.totalorder %s2271_s21, %s2271_s21 }
   0xc   :  { %p2278_p6 = por %p2277_p5, %p2276_p4 }
   0xe   :  { %p2279_p7 = pnand %p2278_p6, %p2272_p3 }
  0x10   :  { %2282 = shalt.err (!%p2279_p7)
}
  0x11   :  { %s2356_s22 = smov 3456   ;;  %s2357_s23 = smov 216  }
  0x12   :  { %32 = dma.hbm_to_vmem [thread:$0]  %s2535_s1, 62208, %s27_s13, [#allocation6], %s2356_s22, %s2356_s22, %s2357_s23  }
  0x13   :  { %s2358_s26 = smov [#allocation2]   ;;  %s2359_s28 = smov [#allocation7]  }
  0x14   :  { %s17_s27 = sshll.u32 %s2358_s26, 4  ;;  %s39_s29 = sshll.u32 %s2359_s28, 4  ;;  %s18_s27 = int_to_ptr.vmem [resolvable:$true] %s17_s27  ;;  %s40_s29 = int_to_ptr.vmem [resolvable:$true] %s39_s29 }
  0x15   :  { %s2283_s5 = scalar_lea.hbm %s2534_s0, 432 }
  0x16   :  { %p2284_p8 = scmp.ne.s32.totalorder %s2534_s0, %s2283_s5  ;;  %p2287_p9 = scmp.lt.u32.totalorder %s2283_s5, %s2534_s0 }
  0x18   :  { %p2289_p10 = pnand %p2287_p9, %p2284_p8 }
  0x1a   :  { %2292 = shalt.err (!%p2289_p10)
}
  0x1b   :  { %s2293_s1 = scalar_lea.vmem %s18_s27, 432  ;;  %s2297_s10 = scalar_lea.vmem %s18_s27, 448 }
  0x1c   :  { %p2294_p11 = scmp.ne.s32.totalorder %s18_s27, %s2293_s1  ;;  %p2298_p12 = scmp.lt.s32.totalorder %s18_s27, %s18_s27 }
  0x1d   :  { %p2299_p13 = scmp.lt.s32.totalorder %s2297_s10, %s2293_s1 }
  0x1f   :  { %p2300_p0 = por %p2299_p13, %p2298_p12 }
  0x21   :  { %p2301_p1 = pnand %p2300_p0, %p2294_p11 }
  0x23   :  { %2304 = shalt.err (!%p2301_p1)
}
  0x24   :  { %20 = dma.hbm_to_vmem [thread:$0]  %s2534_s0, 432, %s18_s27, [#allocation3]  }
  0x25   :  { %s2305_s15 = scalar_lea.hbm %s2536_s2, 32 }
  0x26   :  { %p2306_p2 = scmp.ne.s32.totalorder %s2536_s2, %s2305_s15  ;;  %p2309_p3 = scmp.lt.u32.totalorder %s2305_s15, %s2536_s2 }
  0x28   :  { %p2311_p4 = pnand %p2309_p3, %p2306_p2 }
  0x2a   :  { %2314 = shalt.err (!%p2311_p4)
}
  0x2b   :  { %s2315_s20 = scalar_lea.vmem %s40_s29, 32  ;;  %p2320_p6 = scmp.lt.s32.totalorder %s40_s29, %s40_s29 }
  0x2c   :  { %p2316_p5 = scmp.ne.s32.totalorder %s40_s29, %s2315_s20  ;;  %p2321_p7 = scmp.lt.s32.totalorder %s2315_s20, %s2315_s20 }
  0x2e   :  { %p2322_p8 = por %p2321_p7, %p2320_p6 }
  0x30   :  { %p2323_p9 = pnand %p2322_p8, %p2316_p5 }
  0x32   :  { %2326 = shalt.err (!%p2323_p9)
}
  0x33   :  { %42 = dma.hbm_to_vmem [thread:$0]  %s2536_s2, 32, %s40_s29, [#allocation6]  }
  0x34   :  { %2349 = dma.done.wait [#allocation3], 432  }
  0x35   :  { %2350 = vsyncadd [#allocation3], 4294966864 }
  0x36   :  { %2351 = dma.done.wait [#allocation6], 62240  }
  0x37   :  { %2352 = vsyncadd [#allocation6], 4294905056  ;;  %v57_v0 = vld [vmem:[#allocation5 + $0x8] sm:$0xff]  ;;  %v84_v1 = vld [vmem:[#allocation5 + $0xe0] sm:$0xff]  ;;  %v547_v33 = vlaneseq  ;;  %s2363_s2 = smov [#allocation8]  }
  0x38   :  { %v71_v2 = vld [vmem:[#allocation5 + $0x78] sm:$0xff]  ;;  %v1726_v3 = vpack.c.bf16 %v84_v1, %v57_v0  ;;  %v98_v4 = vld [vmem:[#allocation5 + $0x150] sm:$0xff]  ;;  %v56_v5 = vld [vmem:[#allocation5] sm:$0xff]  ;;  %s1716_s22 = sshll.u32 %s2363_s2, 4  ;;  %s1717_s22 = int_to_ptr.vmem [resolvable:$true] %s1716_s22 }
  0x39   :  { %v83_v6 = vld [vmem:[#allocation5 + $0xd8] sm:$0xff]  ;;  %v1978_v7 = vpack.c.bf16 %v98_v4, %v71_v2  ;;  %v70_v9 = vld [vmem:[#allocation5 + $0x70] sm:$0xff]  ;;  %v97_v10 = vld [vmem:[#allocation5 + $0x148] sm:$0xff]  ;;  %v2421_v42 = vshrl.u32 %v547_v33, 7  ;;  %vm1707_vm0 = vcmp.lt.s32.totalorder %v547_v33, 144  ;;  %s2327_s23 = scalar_lea.vmem %s1717_s22, 32  ;;  %p2332_p11 = scmp.lt.s32.totalorder %s1717_s22, %s1717_s22 }
  0x3a   :  { %v1728_v8 = vpack.c.bf16 %v83_v6, %v56_v5  ;;  %v111_v11 = vld [vmem:[#allocation5 + $0x1b8] sm:$0xff]  ;;  %1727 = vmatprep.subr.bf16.mxu1 %v1726_v3  ;;  %v1980_v12 = vpack.c.bf16 %v97_v10, %v70_v9  ;;  %v138_v13 = vld [vmem:[#allocation5 + $0x290] sm:$0xff]  ;;  %v125_v14 = vld [vmem:[#allocation5 + $0x228] sm:$0xff]  ;;  %p2328_p10 = scmp.ne.s32.totalorder %s1717_s22, %s2327_s23  ;;  %p2333_p12 = scmp.lt.s32.totalorder %s2327_s23, %s2327_s23 }
  0x3b   :  { %v152_v15 = vld [vmem:[#allocation5 + $0x300] sm:$0xff]  ;;  %1979 = vmatprep.subr.bf16.mxu0 %v1978_v7  ;;  %v1730_v16 = vpack.c.bf16 %v138_v13, %v111_v11  ;;  %v110_v18 = vld [vmem:[#allocation5 + $0x1b0] sm:$0xff]  ;;  %v137_v19 = vld [vmem:[#allocation5 + $0x288] sm:$0xff]  ;;  %v2424_v47 = vsub.s32 1, %v2421_v42  ;;  %v2427_v51 = vsub.s32 7, %v2421_v42 }
  0x3c   :  { %1729 = vmatpush1.bf16.xpose.msra.mxu1 %v1728_v8  ;;  %v1982_v17 = vpack.c.bf16 %v152_v15, %v125_v14  ;;  %1981 = vmatpush1.bf16.xpose.msra.mxu0 %v1980_v12  ;;  %v124_v20 = vld [vmem:[#allocation5 + $0x220] sm:$0xff]  ;;  %v151_v21 = vld [vmem:[#allocation5 + $0x2f8] sm:$0xff]  ;;  %v165_v22 = vld [vmem:[#allocation5 + $0x368] sm:$0xff]  ;;  %v1732_v26 = vpack.c.bf16 %v137_v19, %v110_v18  ;;  %p2334_p13 = por %p2333_p12, %p2332_p11 }
  0x3d   :  { %1731 = vmatprep.subr.bf16.mxu1 %v1730_v16  ;;  %v192_v23 = vld [vmem:[#allocation5 + $0x440] sm:$0xff]  ;;  %v179_v24 = vld [vmem:[#allocation5 + $0x3d8] sm:$0xff]  ;;  %v206_v25 = vld [vmem:[#allocation5 + $0x4b0] sm:$0xff]  ;;  %v1984_v27 = vpack.c.bf16 %v151_v21, %v124_v20 }
  0x3e   :  { %1983 = vmatprep.subr.bf16.mxu0 %v1982_v17  ;;  %v1734_v28 = vpack.c.bf16 %v192_v23, %v165_v22  ;;  %v1986_v29 = vpack.c.bf16 %v206_v25, %v179_v24  ;;  %v164_v30 = vld [vmem:[#allocation5 + $0x360] sm:$0xff]  ;;  %v191_v31 = vld [vmem:[#allocation5 + $0x438] sm:$0xff]  ;;  %v178_v32 = vld [vmem:[#allocation5 + $0x3d0] sm:$0xff]  ;;  %p2335_p0 = pnand %p2334_p13, %p2328_p10 }
  0x3f   :  { %v205_v34 = vld [vmem:[#allocation5 + $0x4a8] sm:$0xff]  ;;  %v219_v35 = vld [vmem:[#allocation5 + $0x518] sm:$0xff]  ;;  %v246_v36 = vld [vmem:[#allocation5 + $0x5f0] sm:$0xff]  ;;  %v1736_v39 = vpack.c.bf16 %v191_v31, %v164_v30 }
  0x40   :  { %v233_v37 = vld [vmem:[#allocation5 + $0x588] sm:$0xff]  ;;  %v260_v38 = vld [vmem:[#allocation5 + $0x660] sm:$0xff]  ;;  %v1988_v40 = vpack.c.bf16 %v205_v34, %v178_v32  ;;  %v1738_v41 = vpack.c.bf16 %v246_v36, %v219_v35  ;;  %v218_v44 = vld [vmem:[#allocation5 + $0x510] sm:$0xff] }
  0x41   :  { %v1990_v43 = vpack.c.bf16 %v260_v38, %v233_v37  ;;  %v245_v45 = vld [vmem:[#allocation5 + $0x5e8] sm:$0xff]  ;;  %v232_v46 = vld [vmem:[#allocation5 + $0x580] sm:$0xff]  ;;  %v259_v48 = vld [vmem:[#allocation5 + $0x658] sm:$0xff] }
  0x42   :  { %v273_v49 = vld [vmem:[#allocation5 + $0x6c8] sm:$0xff]  ;;  %v300_v50 = vld [vmem:[#allocation5 + $0x7a0] sm:$0xff]  ;;  %v287_v52 = vld [vmem:[#allocation5 + $0x738] sm:$0xff]  ;;  %v1740_v54 = vpack.c.bf16 %v245_v45, %v218_v44  ;;  %v1992_v56 = vpack.c.bf16 %v259_v48, %v232_v46 }
  0x43   :  { %v314_v53 = vld [vmem:[#allocation5 + $0x810] sm:$0xff]  ;;  %v2429_v55 = vld [vmem:[#allocation2] sm:$0xff]  ;;  %v1742_v57 = vpack.c.bf16 %v300_v50, %v273_v49  ;;  %v299_v63 = vld [vmem:[#allocation5 + $0x798] sm:$0xff] }
  0x44   :  { %1733 = vmatpush1.bf16.xpose.msra.mxu1 %v1732_v26  ;;  %1985 = vmatpush1.bf16.xpose.msra.mxu0 %v1984_v27  ;;  %v554_v58 = vrot.slane %v2429_v55, %v2424_v47  ;;  %v2433_v59 = vld [vmem:[#allocation2 + $0x8] sm:$0xff]  ;;  %v1994_v60 = vpack.c.bf16 %v314_v53, %v287_v52  ;;  %v272_v62 = vld [vmem:[#allocation5 + $0x6c0] sm:$0xff]  ;;  %v327_v2 = vld [vmem:[#allocation5 + $0x878] sm:$0xff] }
  0x45   :  { %1735 = vmatprep.subr.bf16.mxu1 %v1734_v28  ;;  %1987 = vmatprep.subr.bf16.mxu0 %v1986_v29  ;;  %v610_v61 = vrot.slane %v2433_v59, %v2427_v51  ;;  %v286_v0 = vld [vmem:[#allocation5 + $0x730] sm:$0xff]  ;;  %v313_v1 = vld [vmem:[#allocation5 + $0x808] sm:$0xff]  ;;  %v368_v5 = vld [vmem:[#allocation5 + $0x9c0] sm:$0xff]  ;;  %v1744_v6 = vpack.c.bf16 %v299_v63, %v272_v62 }
  0x46   :  { %757 = vmatprep.mubr.f32.mxu1 %v554_v58  ;;  %v354_v3 = vld [vmem:[#allocation5 + $0x950] sm:$0xff]  ;;  %v341_v4 = vld [vmem:[#allocation5 + $0x8e8] sm:$0xff]  ;;  %v1996_v7 = vpack.c.bf16 %v313_v1, %v286_v0  ;;  %v340_v12 = vld [vmem:[#allocation5 + $0x8e0] sm:$0xff]  ;;  %v2438_v0 = vsub.s32 0, %v2421_v42  ;;  %v2441_v1 = vsub.s32 6, %v2421_v42 }
  0x47   :  { %1254 = vmatprep.mubr.f32.mxu0 %v610_v61  ;;  %v1746_v8 = vpack.c.bf16 %v354_v3, %v327_v2  ;;  %v1998_v9 = vpack.c.bf16 %v368_v5, %v341_v4  ;;  %v326_v10 = vld [vmem:[#allocation5 + $0x870] sm:$0xff]  ;;  %v353_v11 = vld [vmem:[#allocation5 + $0x948] sm:$0xff]  ;;  %v367_v13 = vld [vmem:[#allocation5 + $0x9b8] sm:$0xff] }
  0x48   :  { %v381_v14 = vld [vmem:[#allocation5 + $0xa28] sm:$0xff]  ;;  %v408_v15 = vld [vmem:[#allocation5 + $0xb00] sm:$0xff]  ;;  %v395_v16 = vld [vmem:[#allocation5 + $0xa98] sm:$0xff]  ;;  %v1748_v18 = vpack.c.bf16 %v353_v11, %v326_v10  ;;  %v2000_v19 = vpack.c.bf16 %v367_v13, %v340_v12  ;;  %v606_v13 = vrot.slane %v2433_v59, %v2441_v1 }
  0x49   :  { %v422_v17 = vld [vmem:[#allocation5 + $0xb70] sm:$0xff]  ;;  %v1750_v20 = vpack.c.bf16 %v408_v15, %v381_v14  ;;  %v380_v22 = vld [vmem:[#allocation5 + $0xa20] sm:$0xff]  ;;  %v407_v23 = vld [vmem:[#allocation5 + $0xaf8] sm:$0xff] }
  0x4a   :  { %v2002_v21 = vpack.c.bf16 %v422_v17, %v395_v16  ;;  %v394_v24 = vld [vmem:[#allocation5 + $0xa90] sm:$0xff]  ;;  %v421_v25 = vld [vmem:[#allocation5 + $0xb68] sm:$0xff]  ;;  %v435_v26 = vld [vmem:[#allocation5 + $0xbd8] sm:$0xff]  ;;  %v1752_v30 = vpack.c.bf16 %v407_v23, %v380_v22 }
  0x4b   :  { %v462_v27 = vld [vmem:[#allocation5 + $0xcb0] sm:$0xff]  ;;  %v449_v28 = vld [vmem:[#allocation5 + $0xc48] sm:$0xff]  ;;  %v476_v29 = vld [vmem:[#allocation5 + $0xd20] sm:$0xff]  ;;  %v2004_v31 = vpack.c.bf16 %v421_v25, %v394_v24 }
  0x4c   :  { %1737 = vmatpush1.bf16.xpose.msra.mxu1 %v1736_v39  ;;  %1989 = vmatpush1.bf16.xpose.msra.mxu0 %v1988_v40  ;;  %v1754_v32 = vpack.c.bf16 %v462_v27, %v435_v26  ;;  %v2006_v34 = vpack.c.bf16 %v476_v29, %v449_v28  ;;  %v434_v35 = vld [vmem:[#allocation5 + $0xbd0] sm:$0xff]  ;;  %v461_v36 = vld [vmem:[#allocation5 + $0xca8] sm:$0xff]  ;;  %v448_v37 = vld [vmem:[#allocation5 + $0xc40] sm:$0xff] }
  0x4d   :  { %1739 = vmatprep.subr.bf16.mxu1 %v1738_v41  ;;  %1991 = vmatprep.subr.bf16.mxu0 %v1990_v43  ;;  %v475_v38 = vld [vmem:[#allocation5 + $0xd18] sm:$0xff]  ;;  %v489_v39 = vld [vmem:[#allocation5 + $0xd88] sm:$0xff]  ;;  %v516_v40 = vld [vmem:[#allocation5 + $0xe60] sm:$0xff]  ;;  %v1756_v44 = vpack.c.bf16 %v461_v36, %v434_v35 }
  0x4e   :  { %v503_v41 = vld [vmem:[#allocation5 + $0xdf8] sm:$0xff]  ;;  %v530_v43 = vld [vmem:[#allocation5 + $0xed0] sm:$0xff]  ;;  %v2008_v45 = vpack.c.bf16 %v475_v38, %v448_v37  ;;  %v1758_v46 = vpack.c.bf16 %v516_v40, %v489_v39  ;;  %v488_v49 = vld [vmem:[#allocation5 + $0xd80] sm:$0xff] }
  0x4f   :  { %v2010_v48 = vpack.c.bf16 %v530_v43, %v503_v41  ;;  %v515_v50 = vld [vmem:[#allocation5 + $0xe58] sm:$0xff]  ;;  %v502_v52 = vld [vmem:[#allocation5 + $0xdf0] sm:$0xff]  ;;  %v529_v53 = vld [vmem:[#allocation5 + $0xec8] sm:$0xff] }
  0x50   :  { %v100_v58 = vld [vmem:[#allocation5 + $0x160] sm:$0xff]  ;;  %v2012_v61 = vpack.c.bf16 %v529_v53, %v502_v52  ;;  %v58_v2 = vld [vmem:[#allocation5 + $0x10] sm:$0xff]  ;;  %v85_v3 = vld [vmem:[#allocation5 + $0xe8] sm:$0xff] }
  0x51   :  { %v72_v4 = vld [vmem:[#allocation5 + $0x80] sm:$0xff]  ;;  %v99_v5 = vld [vmem:[#allocation5 + $0x158] sm:$0xff]  ;;  %v154_v11 = vld [vmem:[#allocation5 + $0x310] sm:$0xff]  ;;  %v1764_v12 = vpack.c.bf16 %v85_v3, %v58_v2 }
  0x52   :  { %v127_v10 = vld [vmem:[#allocation5 + $0x238] sm:$0xff]  ;;  %v2016_v15 = vpack.c.bf16 %v99_v5, %v72_v4  ;;  %v126_v22 = vld [vmem:[#allocation5 + $0x230] sm:$0xff]  ;;  %v153_v59 = vld [vmem:[#allocation5 + $0x308] sm:$0xff] }
  0x53   :  { %v2450_v14 = vld [vmem:[#allocation2 + $0x10] sm:$0xff]  ;;  %v2018_v17 = vpack.c.bf16 %v154_v11, %v127_v10  ;;  %v181_v25 = vld [vmem:[#allocation5 + $0x3e8] sm:$0xff]  ;;  %v208_v26 = vld [vmem:[#allocation5 + $0x4c0] sm:$0xff]  ;;  %v2020_v28 = vpack.c.bf16 %v153_v59, %v126_v22 }
  0x54   :  { %1741 = vmatpush1.bf16.xpose.msra.mxu1 %v1740_v54  ;;  %1993 = vmatpush1.bf16.xpose.msra.mxu0 %v1992_v56  ;;  %v59_v54 = vld [vmem:[#allocation5 + $0x18] sm:$0xff]  ;;  %v86_v56 = vld [vmem:[#allocation5 + $0xf0] sm:$0xff]  ;;  %v221_v36 = vld [vmem:[#allocation5 + $0x528] sm:$0xff] }
  0x55   :  { %1743 = vmatprep.subr.bf16.mxu1 %v1742_v57  ;;  %1995 = vmatprep.subr.bf16.mxu0 %v1994_v60  ;;  %v73_v57 = vld [vmem:[#allocation5 + $0x88] sm:$0xff]  ;;  %v1760_v60 = vpack.c.bf16 %v515_v50, %v488_v49  ;;  %v1762_v62 = vpack.c.bf16 %v86_v56, %v59_v54  ;;  %v167_v23 = vld [vmem:[#allocation5 + $0x378] sm:$0xff]  ;;  %v194_v24 = vld [vmem:[#allocation5 + $0x450] sm:$0xff] }
  0x56   :  { %v2014_v63 = vpack.c.bf16 %v100_v58, %v73_v57  ;;  %v1770_v29 = vpack.c.bf16 %v194_v24, %v167_v23  ;;  %v207_v35 = vld [vmem:[#allocation5 + $0x4b8] sm:$0xff]  ;;  %v248_v37 = vld [vmem:[#allocation5 + $0x600] sm:$0xff]  ;;  %v262_v39 = vld [vmem:[#allocation5 + $0x670] sm:$0xff] }
  0x57   :  { %v235_v38 = vld [vmem:[#allocation5 + $0x598] sm:$0xff]  ;;  %v1774_v43 = vpack.c.bf16 %v248_v37, %v221_v36  ;;  %v261_v49 = vld [vmem:[#allocation5 + $0x668] sm:$0xff]  ;;  %v302_v52 = vld [vmem:[#allocation5 + $0x7b0] sm:$0xff] }
  0x58   :  { %v275_v50 = vld [vmem:[#allocation5 + $0x6d8] sm:$0xff]  ;;  %v289_v53 = vld [vmem:[#allocation5 + $0x748] sm:$0xff]  ;;  %v316_v54 = vld [vmem:[#allocation5 + $0x820] sm:$0xff] }
  0x59   :  { %v1778_v58 = vpack.c.bf16 %v302_v52, %v275_v50  ;;  %v315_v2 = vld [vmem:[#allocation5 + $0x818] sm:$0xff]  ;;  %v329_v3 = vld [vmem:[#allocation5 + $0x888] sm:$0xff]  ;;  %v356_v4 = vld [vmem:[#allocation5 + $0x960] sm:$0xff] }
  0x5a   :  { %v343_v5 = vld [vmem:[#allocation5 + $0x8f8] sm:$0xff]  ;;  %v1782_v10 = vpack.c.bf16 %v356_v4, %v329_v3  ;;  %v382_v24 = vld [vmem:[#allocation5 + $0xa30] sm:$0xff]  ;;  %v436_v37 = vld [vmem:[#allocation5 + $0xbe0] sm:$0xff]  ;;  %v2457_v4 = vsub.s32 2, %v2421_v42 }
  0x5b   :  { %v490_v52 = vld [vmem:[#allocation5 + $0xd90] sm:$0xff] }
  0x5c   :  { %1745 = vmatpush1.bf16.xpose.msra.mxu1 %v1744_v6  ;;  %1997 = vmatpush1.bf16.xpose.msra.mxu0 %v1996_v7  ;;  %v113_v6 = vld [vmem:[#allocation5 + $0x1c8] sm:$0xff]  ;;  %v140_v7 = vld [vmem:[#allocation5 + $0x2a0] sm:$0xff] }
  0x5d   :  { %1747 = vmatprep.subr.bf16.mxu1 %v1746_v8  ;;  %1999 = vmatprep.subr.bf16.mxu0 %v1998_v9  ;;  %v2444_v8 = vsub.s32 3, %v2421_v42  ;;  %v550_v9 = vrot.slane %v2429_v55, %v2438_v0  ;;  %v1766_v16 = vpack.c.bf16 %v140_v7, %v113_v6  ;;  %v370_v6 = vld [vmem:[#allocation5 + $0x9d0] sm:$0xff] }
  0x5e   :  { %v2034_v11 = vpack.c.bf16 %v370_v6, %v343_v5  ;;  %v60_v5 = vld [vmem:[#allocation5 + $0x20] sm:$0xff]  ;;  %v87_v6 = vld [vmem:[#allocation5 + $0xf8] sm:$0xff] }
  0x64   :  { %1749 = vmatpush1.bf16.xpose.msra.mxu1 %v1748_v18  ;;  %2001 = vmatpush1.bf16.xpose.msra.mxu0 %v2000_v19  ;;  %v562_v18 = vrot.slane %v2429_v55, %v2444_v8  ;;  %v618_v19 = vrot.slane %v2450_v14, %v2424_v47 }
  0x65   :  { %1751 = vmatprep.subr.bf16.mxu1 %v1750_v20  ;;  %2003 = vmatprep.subr.bf16.mxu0 %v2002_v21  ;;  %v112_v20 = vld [vmem:[#allocation5 + $0x1c0] sm:$0xff]  ;;  %v139_v21 = vld [vmem:[#allocation5 + $0x298] sm:$0xff] }
  0x66   :  { %v1768_v27 = vpack.c.bf16 %v139_v21, %v112_v20  ;;  %v424_v20 = vld [vmem:[#allocation5 + $0xb80] sm:$0xff] }
  0x6c   :  { %1753 = vmatpush1.bf16.xpose.msra.mxu1 %v1752_v30  ;;  %2005 = vmatpush1.bf16.xpose.msra.mxu0 %v2004_v31  ;;  %v2022_v30 = vpack.c.bf16 %v208_v26, %v181_v25  ;;  %v166_v31 = vld [vmem:[#allocation5 + $0x370] sm:$0xff]  ;;  %v409_v25 = vld [vmem:[#allocation5 + $0xb08] sm:$0xff]  ;;  %v396_v26 = vld [vmem:[#allocation5 + $0xaa0] sm:$0xff] }
  0x6d   :  { %1755 = vmatprep.subr.bf16.mxu1 %v1754_v32  ;;  %2007 = vmatprep.subr.bf16.mxu0 %v2006_v34  ;;  %v193_v32 = vld [vmem:[#allocation5 + $0x448] sm:$0xff]  ;;  %v180_v34 = vld [vmem:[#allocation5 + $0x3e0] sm:$0xff] }
  0x6e   :  { %v1772_v40 = vpack.c.bf16 %v193_v32, %v166_v31  ;;  %v2024_v41 = vpack.c.bf16 %v207_v35, %v180_v34  ;;  %v478_v31 = vld [vmem:[#allocation5 + $0xd30] sm:$0xff]  ;;  %v1788_v32 = vpack.c.bf16 %v409_v25, %v382_v24  ;;  %v141_v24 = vld [vmem:[#allocation5 + $0x2a8] sm:$0xff]  ;;  %v128_v25 = vld [vmem:[#allocation5 + $0x240] sm:$0xff] }
  0x74   :  { %1757 = vmatpush1.bf16.xpose.msra.mxu1 %v1756_v44  ;;  %2009 = vmatpush1.bf16.xpose.msra.mxu0 %v2008_v45  ;;  %v2026_v44 = vpack.c.bf16 %v262_v39, %v235_v38  ;;  %v220_v45 = vld [vmem:[#allocation5 + $0x520] sm:$0xff]  ;;  %v463_v38 = vld [vmem:[#allocation5 + $0xcb8] sm:$0xff]  ;;  %v450_v39 = vld [vmem:[#allocation5 + $0xc50] sm:$0xff] }
  0x75   :  { %1759 = vmatprep.subr.bf16.mxu1 %v1758_v46  ;;  %2011 = vmatprep.subr.bf16.mxu0 %v2010_v48  ;;  %v247_v46 = vld [vmem:[#allocation5 + $0x5f8] sm:$0xff]  ;;  %v234_v48 = vld [vmem:[#allocation5 + $0x590] sm:$0xff] }
  0x76   :  { %v1776_v56 = vpack.c.bf16 %v247_v46, %v220_v45  ;;  %v2028_v57 = vpack.c.bf16 %v261_v49, %v234_v48  ;;  %v532_v45 = vld [vmem:[#allocation5 + $0xee0] sm:$0xff]  ;;  %v1792_v46 = vpack.c.bf16 %v463_v38, %v436_v37  ;;  %v195_v37 = vld [vmem:[#allocation5 + $0x458] sm:$0xff]  ;;  %v182_v38 = vld [vmem:[#allocation5 + $0x3f0] sm:$0xff] }
  0x7c   :  { %1761 = vmatpush1.bf16.xpose.msra.mxu1 %v1760_v60  ;;  %2013 = vmatpush1.bf16.xpose.msra.mxu0 %v2012_v61  ;;  %v2030_v60 = vpack.c.bf16 %v316_v54, %v289_v53  ;;  %v274_v61 = vld [vmem:[#allocation5 + $0x6d0] sm:$0xff]  ;;  %v517_v53 = vld [vmem:[#allocation5 + $0xe68] sm:$0xff]  ;;  %v504_v54 = vld [vmem:[#allocation5 + $0xe00] sm:$0xff] }
  0x7d   :  { %1763 = vmatprep.subr.bf16.mxu1 %v1762_v62  ;;  %2015 = vmatprep.subr.bf16.mxu0 %v2014_v63  ;;  %v301_v62 = vld [vmem:[#allocation5 + $0x7a8] sm:$0xff]  ;;  %v288_v63 = vld [vmem:[#allocation5 + $0x740] sm:$0xff] }
  0x7e   :  { %v1780_v7 = vpack.c.bf16 %v301_v62, %v274_v61  ;;  %v102_v61 = vld [vmem:[#allocation5 + $0x170] sm:$0xff]  ;;  %v1796_v62 = vpack.c.bf16 %v517_v53, %v490_v52  ;;  %v249_v52 = vld [vmem:[#allocation5 + $0x608] sm:$0xff]  ;;  %v236_v53 = vld [vmem:[#allocation5 + $0x5a0] sm:$0xff] }
  0x83   :  { %758 = vmatmul.mubr.f32.vlgmr.msra.gmra.mrb[0].mxu1 %v550_v9  ;;  %1255 = vmatmul.mubr.f32.vlgmr.msra.gmra.mrb[0].mxu0 %v606_v13  ;;  %v2032_v9 = vpack.c.bf16 %v315_v2, %v288_v63  ;;  %v355_v13 = vld [vmem:[#allocation5 + $0x958] sm:$0xff] }
  0x84   :  { %1765 = vmatpush1.bf16.xpose.msra.mxu1 %v1764_v12  ;;  %2017 = vmatpush1.bf16.xpose.msra.mxu0 %v2016_v15  ;;  %v328_v12 = vld [vmem:[#allocation5 + $0x880] sm:$0xff]  ;;  %v342_v15 = vld [vmem:[#allocation5 + $0x8f0] sm:$0xff] }
  0x85   :  { %1767 = vmatprep.subr.bf16.mxu1 %v1766_v16  ;;  %2019 = vmatprep.subr.bf16.mxu0 %v2018_v17  ;;  %v369_v16 = vld [vmem:[#allocation5 + $0x9c8] sm:$0xff]  ;;  %v383_v17 = vld [vmem:[#allocation5 + $0xa38] sm:$0xff]  ;;  %v1784_v21 = vpack.c.bf16 %v355_v13, %v328_v12  ;;  %v2460_v12 = vsub.s32 5, %v2421_v42  ;;  %v558_v13 = vrot.slane %v2429_v55, %v2457_v4 }
  0x86   :  { %828 = vmatprep.mubr.f32.mxu1 %v562_v18  ;;  %1325 = vmatprep.mubr.f32.mxu0 %v618_v19  ;;  %v410_v18 = vld [vmem:[#allocation5 + $0xb10] sm:$0xff]  ;;  %v397_v19 = vld [vmem:[#allocation5 + $0xaa8] sm:$0xff]  ;;  %v2036_v22 = vpack.c.bf16 %v369_v16, %v342_v15  ;;  %v156_v16 = vld [vmem:[#allocation5 + $0x320] sm:$0xff] }
  0x87   :  { %v1786_v59 = vpack.c.bf16 %v410_v18, %v383_v17  ;;  %v2038_v23 = vpack.c.bf16 %v424_v20, %v397_v19  ;;  %v129_v15 = vld [vmem:[#allocation5 + $0x248] sm:$0xff]  ;;  %v1800_v17 = vpack.c.bf16 %v87_v6, %v60_v5  ;;  %v614_v18 = vrot.slane %v2450_v14, %v2438_v0  ;;  %v303_v5 = vld [vmem:[#allocation5 + $0x7b8] sm:$0xff]  ;;  %v290_v6 = vld [vmem:[#allocation5 + $0x750] sm:$0xff] }
  0x8c   :  { %1769 = vmatpush1.bf16.xpose.msra.mxu1 %v1768_v27  ;;  %2021 = vmatpush1.bf16.xpose.msra.mxu0 %v2020_v28  ;;  %v423_v27 = vld [vmem:[#allocation5 + $0xb78] sm:$0xff]  ;;  %v437_v28 = vld [vmem:[#allocation5 + $0xbe8] sm:$0xff] }
  0x8d   :  { %1771 = vmatprep.subr.bf16.mxu1 %v1770_v29  ;;  %2023 = vmatprep.subr.bf16.mxu0 %v2022_v30  ;;  %v464_v29 = vld [vmem:[#allocation5 + $0xcc0] sm:$0xff]  ;;  %v451_v30 = vld [vmem:[#allocation5 + $0xc58] sm:$0xff]  ;;  %v2040_v34 = vpack.c.bf16 %v423_v27, %v396_v26  ;;  %v169_v27 = vld [vmem:[#allocation5 + $0x388] sm:$0xff] }
  0x8e   :  { %v1790_v35 = vpack.c.bf16 %v464_v29, %v437_v28  ;;  %v2042_v36 = vpack.c.bf16 %v478_v31, %v451_v30  ;;  %v155_v26 = vld [vmem:[#allocation5 + $0x318] sm:$0xff]  ;;  %v196_v28 = vld [vmem:[#allocation5 + $0x460] sm:$0xff]  ;;  %v210_v30 = vld [vmem:[#allocation5 + $0x4d0] sm:$0xff] }
  0x8f   :  { %v183_v29 = vld [vmem:[#allocation5 + $0x3f8] sm:$0xff] }
  0x94   :  { %1773 = vmatpush1.bf16.xpose.msra.mxu1 %v1772_v40  ;;  %2025 = vmatpush1.bf16.xpose.msra.mxu0 %v2024_v41  ;;  %v477_v40 = vld [vmem:[#allocation5 + $0xd28] sm:$0xff]  ;;  %v491_v41 = vld [vmem:[#allocation5 + $0xd98] sm:$0xff] }
  0x95   :  { %1775 = vmatprep.subr.bf16.mxu1 %v1774_v43  ;;  %2027 = vmatprep.subr.bf16.mxu0 %v2026_v44  ;;  %v518_v43 = vld [vmem:[#allocation5 + $0xe70] sm:$0xff]  ;;  %v505_v44 = vld [vmem:[#allocation5 + $0xe08] sm:$0xff]  ;;  %v2044_v48 = vpack.c.bf16 %v477_v40, %v450_v39  ;;  %v223_v40 = vld [vmem:[#allocation5 + $0x538] sm:$0xff] }
  0x96   :  { %v1794_v49 = vpack.c.bf16 %v518_v43, %v491_v41  ;;  %v2046_v50 = vpack.c.bf16 %v532_v45, %v505_v44  ;;  %v209_v39 = vld [vmem:[#allocation5 + $0x4c8] sm:$0xff]  ;;  %v250_v41 = vld [vmem:[#allocation5 + $0x610] sm:$0xff]  ;;  %v264_v44 = vld [vmem:[#allocation5 + $0x680] sm:$0xff] }
  0x97   :  { %v237_v43 = vld [vmem:[#allocation5 + $0x5a8] sm:$0xff] }
  0x9c   :  { %1777 = vmatpush1.bf16.xpose.msra.mxu1 %v1776_v56  ;;  %2029 = vmatpush1.bf16.xpose.msra.mxu0 %v2028_v57  ;;  %v531_v56 = vld [vmem:[#allocation5 + $0xed8] sm:$0xff]  ;;  %v61_v57 = vld [vmem:[#allocation5 + $0x28] sm:$0xff] }
  0x9d   :  { %1779 = vmatprep.subr.bf16.mxu1 %v1778_v58  ;;  %2031 = vmatprep.subr.bf16.mxu0 %v2030_v60  ;;  %v88_v58 = vld [vmem:[#allocation5 + $0x100] sm:$0xff]  ;;  %v75_v60 = vld [vmem:[#allocation5 + $0x98] sm:$0xff]  ;;  %v2048_v63 = vpack.c.bf16 %v531_v56, %v504_v54  ;;  %v277_v56 = vld [vmem:[#allocation5 + $0x6e8] sm:$0xff] }
  0x9e   :  { %v1798_v2 = vpack.c.bf16 %v88_v58, %v61_v57  ;;  %v2050_v3 = vpack.c.bf16 %v102_v61, %v75_v60  ;;  %v263_v54 = vld [vmem:[#allocation5 + $0x678] sm:$0xff]  ;;  %v304_v57 = vld [vmem:[#allocation5 + $0x7c0] sm:$0xff]  ;;  %v318_v60 = vld [vmem:[#allocation5 + $0x830] sm:$0xff] }
  0x9f   :  { %v291_v58 = vld [vmem:[#allocation5 + $0x758] sm:$0xff] }
  0xa4   :  { %1781 = vmatpush1.bf16.xpose.msra.mxu1 %v1780_v7  ;;  %2033 = vmatpush1.bf16.xpose.msra.mxu0 %v2032_v9  ;;  %v74_v7 = vld [vmem:[#allocation5 + $0x90] sm:$0xff]  ;;  %v101_v9 = vld [vmem:[#allocation5 + $0x168] sm:$0xff] }
  0xa5   :  { %1783 = vmatprep.subr.bf16.mxu1 %v1782_v10  ;;  %2035 = vmatprep.subr.bf16.mxu0 %v2034_v11  ;;  %v115_v10 = vld [vmem:[#allocation5 + $0x1d8] sm:$0xff]  ;;  %v142_v11 = vld [vmem:[#allocation5 + $0x2b0] sm:$0xff]  ;;  %v2052_v19 = vpack.c.bf16 %v101_v9, %v74_v7  ;;  %v317_v7 = vld [vmem:[#allocation5 + $0x828] sm:$0xff] }
  0xa6   :  { %v1802_v20 = vpack.c.bf16 %v142_v11, %v115_v10  ;;  %v331_v9 = vld [vmem:[#allocation5 + $0x898] sm:$0xff]  ;;  %v358_v10 = vld [vmem:[#allocation5 + $0x970] sm:$0xff]  ;;  %v345_v11 = vld [vmem:[#allocation5 + $0x908] sm:$0xff] }
  0xac   :  { %1785 = vmatpush1.bf16.xpose.msra.mxu1 %v1784_v21  ;;  %2037 = vmatpush1.bf16.xpose.msra.mxu0 %v2036_v22  ;;  %v2054_v21 = vpack.c.bf16 %v156_v16, %v129_v15  ;;  %v570_v22 = vrot.slane %v2429_v55, %v2460_v12  ;;  %v2068_v16 = vpack.c.bf16 %v317_v7, %v290_v6  ;;  %v104_v6 = vld [vmem:[#allocation5 + $0x180] sm:$0xff] }
  0xad   :  { %1787 = vmatprep.subr.bf16.mxu1 %v1786_v59  ;;  %2039 = vmatprep.subr.bf16.mxu0 %v2038_v23  ;;  %v626_v59 = vrot.slane %v2450_v14, %v2444_v8  ;;  %v114_v23 = vld [vmem:[#allocation5 + $0x1d0] sm:$0xff] }
  0xae   :  { %v1804_v31 = vpack.c.bf16 %v141_v24, %v114_v23  ;;  %v412_v23 = vld [vmem:[#allocation5 + $0xb20] sm:$0xff]  ;;  %v399_v24 = vld [vmem:[#allocation5 + $0xab8] sm:$0xff] }
  0xb4   :  { %1789 = vmatpush1.bf16.xpose.msra.mxu1 %v1788_v32  ;;  %2041 = vmatpush1.bf16.xpose.msra.mxu0 %v2040_v34  ;;  %v2056_v32 = vpack.c.bf16 %v155_v26, %v128_v25  ;;  %v1806_v34 = vpack.c.bf16 %v196_v28, %v169_v27  ;;  %v426_v25 = vld [vmem:[#allocation5 + $0xb90] sm:$0xff] }
  0xb5   :  { %1791 = vmatprep.subr.bf16.mxu1 %v1790_v35  ;;  %2043 = vmatprep.subr.bf16.mxu0 %v2042_v36  ;;  %v2058_v35 = vpack.c.bf16 %v210_v30, %v183_v29  ;;  %v168_v36 = vld [vmem:[#allocation5 + $0x380] sm:$0xff]  ;;  %v2074_v29 = vpack.c.bf16 %v426_v25, %v399_v24  ;;  %v622_v24 = vrot.slane %v2450_v14, %v2457_v4 }
  0xb6   :  { %v1808_v45 = vpack.c.bf16 %v195_v37, %v168_v36  ;;  %v384_v30 = vld [vmem:[#allocation5 + $0xa40] sm:$0xff]  ;;  %v466_v36 = vld [vmem:[#allocation5 + $0xcd0] sm:$0xff]  ;;  %v453_v37 = vld [vmem:[#allocation5 + $0xc68] sm:$0xff] }
  0xbc   :  { %1793 = vmatpush1.bf16.xpose.msra.mxu1 %v1792_v46  ;;  %2045 = vmatpush1.bf16.xpose.msra.mxu0 %v2044_v48  ;;  %v2060_v46 = vpack.c.bf16 %v209_v39, %v182_v38  ;;  %v1810_v48 = vpack.c.bf16 %v250_v41, %v223_v40  ;;  %v480_v38 = vld [vmem:[#allocation5 + $0xd40] sm:$0xff] }
  0xbd   :  { %1795 = vmatprep.subr.bf16.mxu1 %v1794_v49  ;;  %2047 = vmatprep.subr.bf16.mxu0 %v2046_v50  ;;  %v2062_v49 = vpack.c.bf16 %v264_v44, %v237_v43  ;;  %v222_v50 = vld [vmem:[#allocation5 + $0x530] sm:$0xff]  ;;  %v2078_v43 = vpack.c.bf16 %v480_v38, %v453_v37  ;;  %v185_v37 = vld [vmem:[#allocation5 + $0x408] sm:$0xff]  ;;  %v212_v38 = vld [vmem:[#allocation5 + $0x4e0] sm:$0xff] }
  0xbe   :  { %v1812_v61 = vpack.c.bf16 %v249_v52, %v222_v50  ;;  %v438_v44 = vld [vmem:[#allocation5 + $0xbf0] sm:$0xff]  ;;  %v520_v50 = vld [vmem:[#allocation5 + $0xe80] sm:$0xff]  ;;  %v507_v52 = vld [vmem:[#allocation5 + $0xe18] sm:$0xff] }
  0xc4   :  { %1797 = vmatpush1.bf16.xpose.msra.mxu1 %v1796_v62  ;;  %2049 = vmatpush1.bf16.xpose.msra.mxu0 %v2048_v63  ;;  %v2064_v62 = vpack.c.bf16 %v263_v54, %v236_v53  ;;  %v1814_v63 = vpack.c.bf16 %v304_v57, %v277_v56  ;;  %v534_v53 = vld [vmem:[#allocation5 + $0xef0] sm:$0xff] }
  0xc5   :  { %1799 = vmatprep.subr.bf16.mxu1 %v1798_v2  ;;  %2051 = vmatprep.subr.bf16.mxu0 %v2050_v3  ;;  %v2066_v2 = vpack.c.bf16 %v318_v60, %v291_v58  ;;  %v276_v3 = vld [vmem:[#allocation5 + $0x6e0] sm:$0xff]  ;;  %v2082_v58 = vpack.c.bf16 %v534_v53, %v507_v52  ;;  %v266_v52 = vld [vmem:[#allocation5 + $0x690] sm:$0xff] }
  0xc6   :  { %v1816_v15 = vpack.c.bf16 %v303_v5, %v276_v3  ;;  %v492_v60 = vld [vmem:[#allocation5 + $0xda0] sm:$0xff]  ;;  %v90_v3 = vld [vmem:[#allocation5 + $0x110] sm:$0xff]  ;;  %v77_v5 = vld [vmem:[#allocation5 + $0xa8] sm:$0xff] }
  0xcb   :  { %829 = vmatmul.mubr.f32.vlgmr.msra.gmra.mrb[0].mxu1 %v558_v13  ;;  %1326 = vmatmul.mubr.f32.vlgmr.msra.gmra.mrb[0].mxu0 %v614_v18  ;;  %v372_v13 = vld [vmem:[#allocation5 + $0x9e0] sm:$0xff] }
  0xcc   :  { %1801 = vmatpush1.bf16.xpose.msra.mxu1 %v1800_v17  ;;  %2053 = vmatpush1.bf16.xpose.msra.mxu0 %v2052_v19  ;;  %v1818_v17 = vpack.c.bf16 %v358_v10, %v331_v9  ;;  %v2070_v18 = vpack.c.bf16 %v372_v13, %v345_v11  ;;  %v330_v19 = vld [vmem:[#allocation5 + $0x890] sm:$0xff]  ;;  %v2086_v11 = vpack.c.bf16 %v104_v6, %v77_v5  ;;  %v2471_v13 = vsub.s32 4, %v2421_v42  ;;  %v320_v5 = vld [vmem:[#allocation5 + $0x840] sm:$0xff] }
  0xcd   :  { %1803 = vmatprep.subr.bf16.mxu1 %v1802_v20  ;;  %2055 = vmatprep.subr.bf16.mxu0 %v2054_v21  ;;  %v357_v20 = vld [vmem:[#allocation5 + $0x968] sm:$0xff]  ;;  %v344_v21 = vld [vmem:[#allocation5 + $0x900] sm:$0xff] }
  0xce   :  { %899 = vmatprep.mubr.f32.mxu1 %v570_v22  ;;  %1396 = vmatprep.mubr.f32.mxu0 %v626_v59  ;;  %v371_v22 = vld [vmem:[#allocation5 + $0x9d8] sm:$0xff]  ;;  %v385_v59 = vld [vmem:[#allocation5 + $0xa48] sm:$0xff]  ;;  %v1820_v26 = vpack.c.bf16 %v357_v20, %v330_v19  ;;  %v144_v20 = vld [vmem:[#allocation5 + $0x2c0] sm:$0xff] }
  0xcf   :  { %v2072_v27 = vpack.c.bf16 %v371_v22, %v344_v21  ;;  %v1822_v28 = vpack.c.bf16 %v412_v23, %v385_v59  ;;  %v117_v19 = vld [vmem:[#allocation5 + $0x1e8] sm:$0xff]  ;;  %v566_v21 = vrot.slane %v2429_v55, %v2471_v13  ;;  %v131_v22 = vld [vmem:[#allocation5 + $0x258] sm:$0xff]  ;;  %v158_v59 = vld [vmem:[#allocation5 + $0x330] sm:$0xff] }
  0xd4   :  { %1805 = vmatpush1.bf16.xpose.msra.mxu1 %v1804_v31  ;;  %2057 = vmatpush1.bf16.xpose.msra.mxu0 %v2056_v32  ;;  %v411_v31 = vld [vmem:[#allocation5 + $0xb18] sm:$0xff]  ;;  %v398_v32 = vld [vmem:[#allocation5 + $0xab0] sm:$0xff] }
  0xd5   :  { %1807 = vmatprep.subr.bf16.mxu1 %v1806_v34  ;;  %2059 = vmatprep.subr.bf16.mxu0 %v2058_v35  ;;  %v425_v34 = vld [vmem:[#allocation5 + $0xb88] sm:$0xff]  ;;  %v439_v35 = vld [vmem:[#allocation5 + $0xbf8] sm:$0xff]  ;;  %v1824_v39 = vpack.c.bf16 %v411_v31, %v384_v30  ;;  %v116_v30 = vld [vmem:[#allocation5 + $0x1e0] sm:$0xff] }
  0xd6   :  { %v2076_v40 = vpack.c.bf16 %v425_v34, %v398_v32  ;;  %v1826_v41 = vpack.c.bf16 %v466_v36, %v439_v35  ;;  %v143_v31 = vld [vmem:[#allocation5 + $0x2b8] sm:$0xff]  ;;  %v130_v32 = vld [vmem:[#allocation5 + $0x250] sm:$0xff]  ;;  %v157_v34 = vld [vmem:[#allocation5 + $0x328] sm:$0xff] }
  0xd7   :  { %v171_v35 = vld [vmem:[#allocation5 + $0x398] sm:$0xff]  ;;  %v198_v36 = vld [vmem:[#allocation5 + $0x470] sm:$0xff] }
  0xdc   :  { %1809 = vmatpush1.bf16.xpose.msra.mxu1 %v1808_v45  ;;  %2061 = vmatpush1.bf16.xpose.msra.mxu0 %v2060_v46  ;;  %v465_v45 = vld [vmem:[#allocation5 + $0xcc8] sm:$0xff]  ;;  %v452_v46 = vld [vmem:[#allocation5 + $0xc60] sm:$0xff] }
  0xdd   :  { %1811 = vmatprep.subr.bf16.mxu1 %v1810_v48  ;;  %2063 = vmatprep.subr.bf16.mxu0 %v2062_v49  ;;  %v479_v48 = vld [vmem:[#allocation5 + $0xd38] sm:$0xff]  ;;  %v493_v49 = vld [vmem:[#allocation5 + $0xda8] sm:$0xff]  ;;  %v1828_v54 = vpack.c.bf16 %v465_v45, %v438_v44  ;;  %v184_v45 = vld [vmem:[#allocation5 + $0x400] sm:$0xff] }
  0xde   :  { %v2080_v56 = vpack.c.bf16 %v479_v48, %v452_v46  ;;  %v1830_v57 = vpack.c.bf16 %v520_v50, %v493_v49  ;;  %v197_v44 = vld [vmem:[#allocation5 + $0x468] sm:$0xff]  ;;  %v211_v46 = vld [vmem:[#allocation5 + $0x4d8] sm:$0xff]  ;;  %v252_v49 = vld [vmem:[#allocation5 + $0x620] sm:$0xff] }
  0xdf   :  { %v225_v48 = vld [vmem:[#allocation5 + $0x548] sm:$0xff]  ;;  %v239_v50 = vld [vmem:[#allocation5 + $0x5b8] sm:$0xff] }
  0xe4   :  { %1813 = vmatpush1.bf16.xpose.msra.mxu1 %v1812_v61  ;;  %2065 = vmatpush1.bf16.xpose.msra.mxu0 %v2064_v62  ;;  %v519_v61 = vld [vmem:[#allocation5 + $0xe78] sm:$0xff]  ;;  %v506_v62 = vld [vmem:[#allocation5 + $0xe10] sm:$0xff] }
  0xe5   :  { %1815 = vmatprep.subr.bf16.mxu1 %v1814_v63  ;;  %2067 = vmatprep.subr.bf16.mxu0 %v2066_v2  ;;  %v533_v63 = vld [vmem:[#allocation5 + $0xee8] sm:$0xff]  ;;  %v63_v2 = vld [vmem:[#allocation5 + $0x38] sm:$0xff]  ;;  %v1832_v7 = vpack.c.bf16 %v519_v61, %v492_v60  ;;  %v238_v61 = vld [vmem:[#allocation5 + $0x5b0] sm:$0xff] }
  0xe6   :  { %v2084_v9 = vpack.c.bf16 %v533_v63, %v506_v62  ;;  %v1834_v10 = vpack.c.bf16 %v90_v3, %v63_v2  ;;  %v251_v60 = vld [vmem:[#allocation5 + $0x618] sm:$0xff]  ;;  %v265_v62 = vld [vmem:[#allocation5 + $0x688] sm:$0xff]  ;;  %v306_v2 = vld [vmem:[#allocation5 + $0x7d0] sm:$0xff] }
  0xe7   :  { %v279_v63 = vld [vmem:[#allocation5 + $0x6f8] sm:$0xff]  ;;  %v293_v3 = vld [vmem:[#allocation5 + $0x768] sm:$0xff] }
  0xec   :  { %1817 = vmatpush1.bf16.xpose.msra.mxu1 %v1816_v15  ;;  %2069 = vmatpush1.bf16.xpose.msra.mxu0 %v2068_v16  ;;  %v62_v15 = vld [vmem:[#allocation5 + $0x30] sm:$0xff]  ;;  %v89_v16 = vld [vmem:[#allocation5 + $0x108] sm:$0xff] }
  0xed   :  { %1819 = vmatprep.subr.bf16.mxu1 %v1818_v17  ;;  %2071 = vmatprep.subr.bf16.mxu0 %v2070_v18  ;;  %v76_v17 = vld [vmem:[#allocation5 + $0xa0] sm:$0xff]  ;;  %v103_v18 = vld [vmem:[#allocation5 + $0x178] sm:$0xff]  ;;  %v1836_v23 = vpack.c.bf16 %v89_v16, %v62_v15  ;;  %v305_v15 = vld [vmem:[#allocation5 + $0x7c8] sm:$0xff] }
  0xee   :  { %v2088_v25 = vpack.c.bf16 %v103_v18, %v76_v17  ;;  %v292_v16 = vld [vmem:[#allocation5 + $0x760] sm:$0xff]  ;;  %v319_v17 = vld [vmem:[#allocation5 + $0x838] sm:$0xff]  ;;  %v333_v18 = vld [vmem:[#allocation5 + $0x8a8] sm:$0xff] }
  0xf4   :  { %1821 = vmatpush1.bf16.xpose.msra.mxu1 %v1820_v26  ;;  %2073 = vmatpush1.bf16.xpose.msra.mxu0 %v2072_v27  ;;  %v1838_v26 = vpack.c.bf16 %v144_v20, %v117_v19  ;;  %v2090_v27 = vpack.c.bf16 %v158_v59, %v131_v22  ;;  %v360_v19 = vld [vmem:[#allocation5 + $0x980] sm:$0xff]  ;;  %v347_v20 = vld [vmem:[#allocation5 + $0x918] sm:$0xff]  ;;  %v2104_v59 = vpack.c.bf16 %v319_v17, %v292_v16  ;;  %v106_v16 = vld [vmem:[#allocation5 + $0x190] sm:$0xff] }
  0xf5   :  { %1823 = vmatprep.subr.bf16.mxu1 %v1822_v28  ;;  %2075 = vmatprep.subr.bf16.mxu0 %v2074_v29  ;;  %v578_v28 = vrot.slane %v2429_v55, %v2427_v51  ;;  %v634_v29 = vrot.slane %v2450_v14, %v2460_v12  ;;  %v1840_v55 = vpack.c.bf16 %v143_v31, %v116_v30  ;;  %v414_v30 = vld [vmem:[#allocation5 + $0xb30] sm:$0xff]  ;;  %v401_v31 = vld [vmem:[#allocation5 + $0xac8] sm:$0xff] }
  0xfc   :  { %1825 = vmatpush1.bf16.xpose.msra.mxu1 %v1824_v39  ;;  %2077 = vmatpush1.bf16.xpose.msra.mxu0 %v2076_v40  ;;  %v2092_v39 = vpack.c.bf16 %v157_v34, %v130_v32  ;;  %v1842_v40 = vpack.c.bf16 %v198_v36, %v171_v35  ;;  %v428_v32 = vld [vmem:[#allocation5 + $0xba0] sm:$0xff] }
  0xfd   :  { %1827 = vmatprep.subr.bf16.mxu1 %v1826_v41  ;;  %2079 = vmatprep.subr.bf16.mxu0 %v2078_v43  ;;  %v2094_v41 = vpack.c.bf16 %v212_v38, %v185_v37  ;;  %v170_v43 = vld [vmem:[#allocation5 + $0x390] sm:$0xff]  ;;  %v2110_v37 = vpack.c.bf16 %v428_v32, %v401_v31  ;;  %v630_v31 = vrot.slane %v2450_v14, %v2471_v13 }
  0xfe   :  { %v1844_v53 = vpack.c.bf16 %v197_v44, %v170_v43  ;;  %v386_v38 = vld [vmem:[#allocation5 + $0xa50] sm:$0xff]  ;;  %v468_v43 = vld [vmem:[#allocation5 + $0xce0] sm:$0xff]  ;;  %v455_v44 = vld [vmem:[#allocation5 + $0xc78] sm:$0xff] }
 0x104   :  { %1829 = vmatpush1.bf16.xpose.msra.mxu1 %v1828_v54  ;;  %2081 = vmatpush1.bf16.xpose.msra.mxu0 %v2080_v56  ;;  %v2096_v54 = vpack.c.bf16 %v211_v46, %v184_v45  ;;  %v1846_v56 = vpack.c.bf16 %v252_v49, %v225_v48  ;;  %v482_v45 = vld [vmem:[#allocation5 + $0xd50] sm:$0xff] }
 0x105   :  { %1831 = vmatprep.subr.bf16.mxu1 %v1830_v57  ;;  %2083 = vmatprep.subr.bf16.mxu0 %v2082_v58  ;;  %v2098_v57 = vpack.c.bf16 %v266_v52, %v239_v50  ;;  %v224_v58 = vld [vmem:[#allocation5 + $0x540] sm:$0xff]  ;;  %v2114_v50 = vpack.c.bf16 %v482_v45, %v455_v44  ;;  %v187_v45 = vld [vmem:[#allocation5 + $0x418] sm:$0xff] }
 0x106   :  { %v1848_v6 = vpack.c.bf16 %v251_v60, %v224_v58  ;;  %v440_v52 = vld [vmem:[#allocation5 + $0xc00] sm:$0xff]  ;;  %v522_v58 = vld [vmem:[#allocation5 + $0xe90] sm:$0xff]  ;;  %v509_v60 = vld [vmem:[#allocation5 + $0xe28] sm:$0xff] }
 0x107   :  { %v200_v44 = vld [vmem:[#allocation5 + $0x480] sm:$0xff] }
 0x10c   :  { %1833 = vmatpush1.bf16.xpose.msra.mxu1 %v1832_v7  ;;  %2085 = vmatpush1.bf16.xpose.msra.mxu0 %v2084_v9  ;;  %v2100_v7 = vpack.c.bf16 %v265_v62, %v238_v61  ;;  %v1850_v9 = vpack.c.bf16 %v306_v2, %v279_v63  ;;  %v536_v61 = vld [vmem:[#allocation5 + $0xf00] sm:$0xff] }
 0x10d   :  { %1835 = vmatprep.subr.bf16.mxu1 %v1834_v10  ;;  %2087 = vmatprep.subr.bf16.mxu0 %v2086_v11  ;;  %v2102_v10 = vpack.c.bf16 %v320_v5, %v293_v3  ;;  %v278_v11 = vld [vmem:[#allocation5 + $0x6f0] sm:$0xff]  ;;  %v2118_v3 = vpack.c.bf16 %v536_v61, %v509_v60  ;;  %v268_v60 = vld [vmem:[#allocation5 + $0x6a0] sm:$0xff] }
 0x10e   :  { %v1852_v22 = vpack.c.bf16 %v305_v15, %v278_v11  ;;  %v494_v5 = vld [vmem:[#allocation5 + $0xdb0] sm:$0xff]  ;;  %v92_v11 = vld [vmem:[#allocation5 + $0x120] sm:$0xff]  ;;  %v79_v15 = vld [vmem:[#allocation5 + $0xb8] sm:$0xff] }
 0x113   :  { %900 = vmatmul.mubr.f32.vlgmr.msra.gmra.mrb[0].mxu1 %v566_v21  ;;  %1397 = vmatmul.mubr.f32.vlgmr.msra.gmra.mrb[0].mxu0 %v622_v24  ;;  %v374_v21 = vld [vmem:[#allocation5 + $0x9f0] sm:$0xff] }
 0x114   :  { %1837 = vmatpush1.bf16.xpose.msra.mxu1 %v1836_v23  ;;  %2089 = vmatpush1.bf16.xpose.msra.mxu0 %v2088_v25  ;;  %v1854_v23 = vpack.c.bf16 %v360_v19, %v333_v18  ;;  %v2106_v24 = vpack.c.bf16 %v374_v21, %v347_v20  ;;  %v332_v25 = vld [vmem:[#allocation5 + $0x8a0] sm:$0xff]  ;;  %v2122_v20 = vpack.c.bf16 %v106_v16, %v79_v15  ;;  %v322_v15 = vld [vmem:[#allocation5 + $0x850] sm:$0xff] }
 0x115   :  { %1839 = vmatprep.subr.bf16.mxu1 %v1838_v26  ;;  %2091 = vmatprep.subr.bf16.mxu0 %v2090_v27  ;;  %v359_v26 = vld [vmem:[#allocation5 + $0x978] sm:$0xff]  ;;  %v346_v27 = vld [vmem:[#allocation5 + $0x910] sm:$0xff]  ;;  %v64_v21 = vld [vmem:[#allocation5 + $0x40] sm:$0xff] }
 0x116   :  { %970 = vmatprep.mubr.f32.mxu1 %v578_v28  ;;  %1467 = vmatprep.mubr.f32.mxu0 %v634_v29  ;;  %v373_v28 = vld [vmem:[#allocation5 + $0x9e8] sm:$0xff]  ;;  %v387_v29 = vld [vmem:[#allocation5 + $0xa58] sm:$0xff]  ;;  %v1856_v34 = vpack.c.bf16 %v359_v26, %v332_v25  ;;  %v146_v25 = vld [vmem:[#allocation5 + $0x2d0] sm:$0xff] }
 0x117   :  { %v2108_v35 = vpack.c.bf16 %v373_v28, %v346_v27  ;;  %v1858_v36 = vpack.c.bf16 %v414_v30, %v387_v29  ;;  %v2258_v26 = vld [vmem:[#allocation2] sm:$0xff] }
 0x118   :  { %v574_v27 = vrot.slane %v2258_v26, %v2441_v1  ;;  %v133_v28 = vld [vmem:[#allocation5 + $0x268] sm:$0xff]  ;;  %v160_v29 = vld [vmem:[#allocation5 + $0x340] sm:$0xff] }
 0x119   :  { %v376_v26 = vld [vmem:[#allocation5 + $0xa00] sm:$0xff] }
 0x11c   :  { %1841 = vmatpush1.bf16.xpose.msra.mxu1 %v1840_v55  ;;  %2093 = vmatpush1.bf16.xpose.msra.mxu0 %v2092_v39  ;;  %v413_v55 = vld [vmem:[#allocation5 + $0xb28] sm:$0xff]  ;;  %v400_v39 = vld [vmem:[#allocation5 + $0xac0] sm:$0xff] }
 0x11d   :  { %1843 = vmatprep.subr.bf16.mxu1 %v1842_v40  ;;  %2095 = vmatprep.subr.bf16.mxu0 %v2094_v41  ;;  %v427_v40 = vld [vmem:[#allocation5 + $0xb98] sm:$0xff]  ;;  %v441_v41 = vld [vmem:[#allocation5 + $0xc08] sm:$0xff]  ;;  %v1860_v46 = vpack.c.bf16 %v413_v55, %v386_v38  ;;  %v642_v38 = vrot.slane %v2450_v14, %v2427_v51  ;;  %v118_v55 = vld [vmem:[#allocation5 + $0x1f0] sm:$0xff] }
 0x11e   :  { %v2112_v48 = vpack.c.bf16 %v427_v40, %v400_v39  ;;  %v1862_v49 = vpack.c.bf16 %v468_v43, %v441_v41  ;;  %v145_v39 = vld [vmem:[#allocation5 + $0x2c8] sm:$0xff]  ;;  %v132_v40 = vld [vmem:[#allocation5 + $0x260] sm:$0xff]  ;;  %v159_v41 = vld [vmem:[#allocation5 + $0x338] sm:$0xff] }
 0x11f   :  { %v173_v43 = vld [vmem:[#allocation5 + $0x3a8] sm:$0xff]  ;;  %v172_v51 = vld [vmem:[#allocation5 + $0x3a0] sm:$0xff]  ;;  %v199_v14 = vld [vmem:[#allocation5 + $0x478] sm:$0xff] }
 0x120   :  { %v1880_v61 = vpack.c.bf16 %v199_v14, %v172_v51  ;;  %v457_v51 = vld [vmem:[#allocation5 + $0xc88] sm:$0xff]  ;;  %v484_v14 = vld [vmem:[#allocation5 + $0xd60] sm:$0xff] }
 0x124   :  { %1845 = vmatpush1.bf16.xpose.msra.mxu1 %v1844_v53  ;;  %2097 = vmatpush1.bf16.xpose.msra.mxu0 %v2096_v54  ;;  %v467_v53 = vld [vmem:[#allocation5 + $0xcd8] sm:$0xff]  ;;  %v454_v54 = vld [vmem:[#allocation5 + $0xc70] sm:$0xff] }
 0x125   :  { %1847 = vmatprep.subr.bf16.mxu1 %v1846_v56  ;;  %2099 = vmatprep.subr.bf16.mxu0 %v2098_v57  ;;  %v481_v56 = vld [vmem:[#allocation5 + $0xd48] sm:$0xff]  ;;  %v495_v57 = vld [vmem:[#allocation5 + $0xdb8] sm:$0xff]  ;;  %v1864_v62 = vpack.c.bf16 %v467_v53, %v440_v52  ;;  %v186_v53 = vld [vmem:[#allocation5 + $0x410] sm:$0xff] }
 0x126   :  { %v2116_v63 = vpack.c.bf16 %v481_v56, %v454_v54  ;;  %v1866_v2 = vpack.c.bf16 %v522_v58, %v495_v57  ;;  %v213_v54 = vld [vmem:[#allocation5 + $0x4e8] sm:$0xff]  ;;  %v227_v56 = vld [vmem:[#allocation5 + $0x558] sm:$0xff]  ;;  %v254_v57 = vld [vmem:[#allocation5 + $0x630] sm:$0xff] }
 0x127   :  { %v241_v58 = vld [vmem:[#allocation5 + $0x5c8] sm:$0xff] }
 0x12c   :  { %1849 = vmatpush1.bf16.xpose.msra.mxu1 %v1848_v6  ;;  %2101 = vmatpush1.bf16.xpose.msra.mxu0 %v2100_v7  ;;  %v521_v6 = vld [vmem:[#allocation5 + $0xe88] sm:$0xff]  ;;  %v508_v7 = vld [vmem:[#allocation5 + $0xe20] sm:$0xff] }
 0x12d   :  { %1851 = vmatprep.subr.bf16.mxu1 %v1850_v9  ;;  %2103 = vmatprep.subr.bf16.mxu0 %v2102_v10  ;;  %v535_v9 = vld [vmem:[#allocation5 + $0xef8] sm:$0xff]  ;;  %v65_v10 = vld [vmem:[#allocation5 + $0x48] sm:$0xff]  ;;  %v1868_v17 = vpack.c.bf16 %v521_v6, %v494_v5  ;;  %v240_v6 = vld [vmem:[#allocation5 + $0x5c0] sm:$0xff] }
 0x12e   :  { %v2120_v18 = vpack.c.bf16 %v535_v9, %v508_v7  ;;  %v1870_v19 = vpack.c.bf16 %v92_v11, %v65_v10  ;;  %v253_v5 = vld [vmem:[#allocation5 + $0x628] sm:$0xff]  ;;  %v267_v7 = vld [vmem:[#allocation5 + $0x698] sm:$0xff]  ;;  %v308_v10 = vld [vmem:[#allocation5 + $0x7e0] sm:$0xff] }
 0x12f   :  { %v281_v9 = vld [vmem:[#allocation5 + $0x708] sm:$0xff]  ;;  %v295_v11 = vld [vmem:[#allocation5 + $0x778] sm:$0xff] }
 0x134   :  { %1853 = vmatpush1.bf16.xpose.msra.mxu1 %v1852_v22  ;;  %2105 = vmatpush1.bf16.xpose.msra.mxu0 %v2104_v59  ;;  %v91_v22 = vld [vmem:[#allocation5 + $0x118] sm:$0xff]  ;;  %v78_v59 = vld [vmem:[#allocation5 + $0xb0] sm:$0xff] }
 0x135   :  { %1855 = vmatprep.subr.bf16.mxu1 %v1854_v23  ;;  %2107 = vmatprep.subr.bf16.mxu0 %v2106_v24  ;;  %v105_v23 = vld [vmem:[#allocation5 + $0x188] sm:$0xff]  ;;  %v119_v24 = vld [vmem:[#allocation5 + $0x1f8] sm:$0xff]  ;;  %v1872_v30 = vpack.c.bf16 %v91_v22, %v64_v21  ;;  %v294_v22 = vld [vmem:[#allocation5 + $0x770] sm:$0xff] }
 0x136   :  { %v2124_v32 = vpack.c.bf16 %v105_v23, %v78_v59  ;;  %v307_v21 = vld [vmem:[#allocation5 + $0x7d8] sm:$0xff]  ;;  %v321_v59 = vld [vmem:[#allocation5 + $0x848] sm:$0xff] }
 0x137   :  { %v335_v23 = vld [vmem:[#allocation5 + $0x8b8] sm:$0xff] }
 0x13c   :  { %1857 = vmatpush1.bf16.xpose.msra.mxu1 %v1856_v34  ;;  %2109 = vmatpush1.bf16.xpose.msra.mxu0 %v2108_v35  ;;  %v1874_v34 = vpack.c.bf16 %v146_v25, %v119_v24  ;;  %v2126_v35 = vpack.c.bf16 %v160_v29, %v133_v28  ;;  %v362_v24 = vld [vmem:[#allocation5 + $0x990] sm:$0xff]  ;;  %v349_v25 = vld [vmem:[#allocation5 + $0x928] sm:$0xff]  ;;  %v2140_v28 = vpack.c.bf16 %v321_v59, %v294_v22 }
 0x13d   :  { %1859 = vmatprep.subr.bf16.mxu1 %v1858_v36  ;;  %2111 = vmatprep.subr.bf16.mxu0 %v2110_v37  ;;  %v2484_v36 = vld [vmem:[#allocation2 + $0x8] sm:$0xff]  ;;  %v1890_v29 = vpack.c.bf16 %v362_v24, %v335_v23 }
 0x13e   :  { %v586_v37 = vrot.slane %v2484_v36, %v2424_v47 }
 0x144   :  { %1861 = vmatpush1.bf16.xpose.msra.mxu1 %v1860_v46  ;;  %2113 = vmatpush1.bf16.xpose.msra.mxu0 %v2112_v48  ;;  %v214_v46 = vld [vmem:[#allocation5 + $0x4f0] sm:$0xff]  ;;  %v1876_v48 = vpack.c.bf16 %v145_v39, %v118_v55  ;;  %v403_v55 = vld [vmem:[#allocation5 + $0xad8] sm:$0xff] }
 0x145   :  { %1863 = vmatprep.subr.bf16.mxu1 %v1862_v49  ;;  %2115 = vmatprep.subr.bf16.mxu0 %v2114_v50  ;;  %v2128_v49 = vpack.c.bf16 %v159_v41, %v132_v40  ;;  %v1878_v50 = vpack.c.bf16 %v200_v44, %v173_v43  ;;  %v2130_v52 = vpack.c.bf16 %v214_v46, %v187_v45  ;;  %v430_v39 = vld [vmem:[#allocation5 + $0xbb0] sm:$0xff]  ;;  %v388_v45 = vld [vmem:[#allocation5 + $0xa60] sm:$0xff]  ;;  %v415_v46 = vld [vmem:[#allocation5 + $0xb38] sm:$0xff] }
 0x146   :  { %v2146_v44 = vpack.c.bf16 %v430_v39, %v403_v55  ;;  %v2493_v55 = vld [vmem:[#allocation2 + $0x18] sm:$0x7] }
 0x14c   :  { %1865 = vmatpush1.bf16.xpose.msra.mxu1 %v1864_v62  ;;  %2117 = vmatpush1.bf16.xpose.msra.mxu0 %v2116_v63  ;;  %v2132_v62 = vpack.c.bf16 %v213_v54, %v186_v53  ;;  %v1882_v63 = vpack.c.bf16 %v254_v57, %v227_v56  ;;  %v1896_v53 = vpack.c.bf16 %v415_v46, %v388_v45  ;;  %v120_v45 = vld [vmem:[#allocation5 + $0x200] sm:$0xff]  ;;  %v147_v46 = vld [vmem:[#allocation5 + $0x2d8] sm:$0xff] }
 0x14d   :  { %1867 = vmatprep.subr.bf16.mxu1 %v1866_v2  ;;  %2119 = vmatprep.subr.bf16.mxu0 %v2118_v3  ;;  %v2134_v2 = vpack.c.bf16 %v268_v60, %v241_v58  ;;  %v226_v3 = vld [vmem:[#allocation5 + $0x550] sm:$0xff]  ;;  %v2150_v57 = vpack.c.bf16 %v484_v14, %v457_v51  ;;  %v469_v60 = vld [vmem:[#allocation5 + $0xce8] sm:$0xff]  ;;  %v216_v51 = vld [vmem:[#allocation5 + $0x500] sm:$0xff] }
 0x14e   :  { %v1884_v16 = vpack.c.bf16 %v253_v5, %v226_v3  ;;  %v442_v58 = vld [vmem:[#allocation5 + $0xc10] sm:$0xff]  ;;  %v511_v3 = vld [vmem:[#allocation5 + $0xe38] sm:$0xff] }
 0x14f   :  { %v538_v5 = vld [vmem:[#allocation5 + $0xf10] sm:$0xff] }
 0x154   :  { %1869 = vmatpush1.bf16.xpose.msra.mxu1 %v1868_v17  ;;  %2121 = vmatpush1.bf16.xpose.msra.mxu0 %v2120_v18  ;;  %v2136_v17 = vpack.c.bf16 %v267_v7, %v240_v6  ;;  %v1886_v18 = vpack.c.bf16 %v308_v10, %v281_v9  ;;  %v1900_v6 = vpack.c.bf16 %v469_v60, %v442_v58  ;;  %v188_v58 = vld [vmem:[#allocation5 + $0x420] sm:$0xff]  ;;  %v215_v60 = vld [vmem:[#allocation5 + $0x4f8] sm:$0xff] }
 0x155   :  { %1871 = vmatprep.subr.bf16.mxu1 %v1870_v19  ;;  %2123 = vmatprep.subr.bf16.mxu0 %v2122_v20  ;;  %v2138_v19 = vpack.c.bf16 %v322_v15, %v295_v11  ;;  %v280_v20 = vld [vmem:[#allocation5 + $0x700] sm:$0xff]  ;;  %v2154_v10 = vpack.c.bf16 %v538_v5, %v511_v3  ;;  %v523_v15 = vld [vmem:[#allocation5 + $0xe98] sm:$0xff]  ;;  %v2168_v5 = vpack.c.bf16 %v215_v60, %v188_v58 }
 0x156   :  { %v496_v11 = vld [vmem:[#allocation5 + $0xdc0] sm:$0xff] }
 0x157   :  { %v1904_v22 = vpack.c.bf16 %v523_v15, %v496_v11  ;;  %v242_v11 = vld [vmem:[#allocation5 + $0x5d0] sm:$0xff]  ;;  %v269_v15 = vld [vmem:[#allocation5 + $0x6a8] sm:$0xff] }
 0x15b   :  { %971 = vmatmul.mubr.f32.vlgmr.msra.gmra.mrb[0].mxu1 %v574_v27  ;;  %1468 = vmatmul.mubr.f32.vlgmr.msra.gmra.mrb[0].mxu0 %v630_v31  ;;  %v1888_v27 = vpack.c.bf16 %v307_v21, %v280_v20  ;;  %v334_v31 = vld [vmem:[#allocation5 + $0x8b0] sm:$0xff]  ;;  %v81_v20 = vld [vmem:[#allocation5 + $0xc8] sm:$0xff]  ;;  %v108_v21 = vld [vmem:[#allocation5 + $0x1a0] sm:$0xff] }
 0x15c   :  { %1873 = vmatpush1.bf16.xpose.msra.mxu1 %v1872_v30  ;;  %2125 = vmatpush1.bf16.xpose.msra.mxu0 %v2124_v32  ;;  %v2142_v30 = vpack.c.bf16 %v376_v26, %v349_v25  ;;  %v361_v32 = vld [vmem:[#allocation5 + $0x988] sm:$0xff]  ;;  %v2158_v24 = vpack.c.bf16 %v108_v21, %v81_v20  ;;  %v66_v25 = vld [vmem:[#allocation5 + $0x50] sm:$0xff]  ;;  %v2172_v21 = vpack.c.bf16 %v269_v15, %v242_v11 }
 0x15d   :  { %1875 = vmatprep.subr.bf16.mxu1 %v1874_v34  ;;  %2127 = vmatprep.subr.bf16.mxu0 %v2126_v35  ;;  %v348_v34 = vld [vmem:[#allocation5 + $0x920] sm:$0xff]  ;;  %v375_v35 = vld [vmem:[#allocation5 + $0x9f8] sm:$0xff]  ;;  %v1892_v40 = vpack.c.bf16 %v361_v32, %v334_v31  ;;  %v93_v26 = vld [vmem:[#allocation5 + $0x128] sm:$0xff]  ;;  %v582_v31 = vrot.slane %v2484_v36, %v2438_v0 }
 0x15e   :  { %1041 = vmatprep.mubr.f32.mxu1 %v586_v37  ;;  %1538 = vmatprep.mubr.f32.mxu0 %v642_v38  ;;  %v389_v37 = vld [vmem:[#allocation5 + $0xa68] sm:$0xff]  ;;  %v416_v38 = vld [vmem:[#allocation5 + $0xb40] sm:$0xff]  ;;  %v2144_v41 = vpack.c.bf16 %v375_v35, %v348_v34  ;;  %v135_v32 = vld [vmem:[#allocation5 + $0x278] sm:$0xff]  ;;  %v1908_v35 = vpack.c.bf16 %v93_v26, %v66_v25 }
 0x15f   :  { %v1894_v43 = vpack.c.bf16 %v416_v38, %v389_v37  ;;  %v162_v34 = vld [vmem:[#allocation5 + $0x350] sm:$0xff]  ;;  %v296_v25 = vld [vmem:[#allocation5 + $0x780] sm:$0xff]  ;;  %v323_v26 = vld [vmem:[#allocation5 + $0x858] sm:$0xff] }
 0x160   :  { %v2260_v37 = vld [vmem:[#allocation2 + $0x10] sm:$0xff] }
 0x161   :  { %v638_v38 = vrot.slane %v2260_v37, %v2441_v1  ;;  %v161_v1 = vld [vmem:[#allocation5 + $0x348] sm:$0xff]  ;;  %v336_v37 = vld [vmem:[#allocation5 + $0x8c0] sm:$0xff] }
 0x164   :  { %1877 = vmatpush1.bf16.xpose.msra.mxu1 %v1876_v48  ;;  %2129 = vmatpush1.bf16.xpose.msra.mxu0 %v2128_v49  ;;  %v402_v48 = vld [vmem:[#allocation5 + $0xad0] sm:$0xff]  ;;  %v429_v49 = vld [vmem:[#allocation5 + $0xba8] sm:$0xff] }
 0x165   :  { %1879 = vmatprep.subr.bf16.mxu1 %v1878_v50  ;;  %2131 = vmatprep.subr.bf16.mxu0 %v2130_v52  ;;  %v443_v50 = vld [vmem:[#allocation5 + $0xc18] sm:$0xff]  ;;  %v470_v52 = vld [vmem:[#allocation5 + $0xcf0] sm:$0xff]  ;;  %v2148_v54 = vpack.c.bf16 %v429_v49, %v402_v48 }
 0x166   :  { %v1898_v56 = vpack.c.bf16 %v470_v52, %v443_v50  ;;  %v134_v48 = vld [vmem:[#allocation5 + $0x270] sm:$0xff]  ;;  %v175_v49 = vld [vmem:[#allocation5 + $0x3b8] sm:$0xff]  ;;  %v189_v52 = vld [vmem:[#allocation5 + $0x428] sm:$0xff] }
 0x167   :  { %v202_v50 = vld [vmem:[#allocation5 + $0x490] sm:$0xff]  ;;  %v2164_v14 = vpack.c.bf16 %v161_v1, %v134_v48 }
 0x16c   :  { %1881 = vmatpush1.bf16.xpose.msra.mxu1 %v1880_v61  ;;  %2133 = vmatpush1.bf16.xpose.msra.mxu0 %v2132_v62  ;;  %v456_v61 = vld [vmem:[#allocation5 + $0xc80] sm:$0xff]  ;;  %v483_v62 = vld [vmem:[#allocation5 + $0xd58] sm:$0xff] }
 0x16d   :  { %1883 = vmatprep.subr.bf16.mxu1 %v1882_v63  ;;  %2135 = vmatprep.subr.bf16.mxu0 %v2134_v2  ;;  %v497_v63 = vld [vmem:[#allocation5 + $0xdc8] sm:$0xff]  ;;  %v524_v2 = vld [vmem:[#allocation5 + $0xea0] sm:$0xff]  ;;  %v2152_v7 = vpack.c.bf16 %v483_v62, %v456_v61 }
 0x16e   :  { %v1902_v9 = vpack.c.bf16 %v524_v2, %v497_v63  ;;  %v229_v61 = vld [vmem:[#allocation5 + $0x568] sm:$0xff]  ;;  %v256_v62 = vld [vmem:[#allocation5 + $0x640] sm:$0xff]  ;;  %v243_v63 = vld [vmem:[#allocation5 + $0x5d8] sm:$0xff] }
 0x16f   :  { %v270_v2 = vld [vmem:[#allocation5 + $0x6b0] sm:$0xff] }
 0x174   :  { %1885 = vmatpush1.bf16.xpose.msra.mxu1 %v1884_v16  ;;  %2137 = vmatpush1.bf16.xpose.msra.mxu0 %v2136_v17  ;;  %v510_v16 = vld [vmem:[#allocation5 + $0xe30] sm:$0xff]  ;;  %v537_v17 = vld [vmem:[#allocation5 + $0xf08] sm:$0xff] }
 0x175   :  { %1887 = vmatprep.subr.bf16.mxu1 %v1886_v18  ;;  %2139 = vmatprep.subr.bf16.mxu0 %v2138_v19  ;;  %v67_v18 = vld [vmem:[#allocation5 + $0x58] sm:$0xff]  ;;  %v94_v19 = vld [vmem:[#allocation5 + $0x130] sm:$0xff]  ;;  %v2156_v59 = vpack.c.bf16 %v537_v17, %v510_v16 }
 0x176   :  { %v1906_v23 = vpack.c.bf16 %v94_v19, %v67_v18  ;;  %v283_v16 = vld [vmem:[#allocation5 + $0x718] sm:$0xff]  ;;  %v310_v17 = vld [vmem:[#allocation5 + $0x7f0] sm:$0xff]  ;;  %v297_v18 = vld [vmem:[#allocation5 + $0x788] sm:$0xff] }
 0x177   :  { %v324_v19 = vld [vmem:[#allocation5 + $0x860] sm:$0xff] }
 0x17c   :  { %1889 = vmatpush1.bf16.xpose.msra.mxu1 %v1888_v27  ;;  %2141 = vmatpush1.bf16.xpose.msra.mxu0 %v2140_v28  ;;  %v80_v27 = vld [vmem:[#allocation5 + $0xc0] sm:$0xff]  ;;  %v107_v28 = vld [vmem:[#allocation5 + $0x198] sm:$0xff] }
 0x17d   :  { %1891 = vmatprep.subr.bf16.mxu1 %v1890_v29  ;;  %2143 = vmatprep.subr.bf16.mxu0 %v2142_v30  ;;  %v121_v29 = vld [vmem:[#allocation5 + $0x208] sm:$0xff]  ;;  %v148_v30 = vld [vmem:[#allocation5 + $0x2e0] sm:$0xff]  ;;  %v2160_v39 = vpack.c.bf16 %v107_v28, %v80_v27 }
 0x17e   :  { %v337_v27 = vld [vmem:[#allocation5 + $0x8c8] sm:$0xff]  ;;  %v364_v28 = vld [vmem:[#allocation5 + $0x9a0] sm:$0xff] }
 0x184   :  { %1893 = vmatpush1.bf16.xpose.msra.mxu1 %v1892_v40  ;;  %2145 = vmatpush1.bf16.xpose.msra.mxu0 %v2144_v41  ;;  %v1910_v40 = vpack.c.bf16 %v148_v30, %v121_v29  ;;  %v2162_v41 = vpack.c.bf16 %v162_v34, %v135_v32  ;;  %v351_v29 = vld [vmem:[#allocation5 + $0x938] sm:$0xff]  ;;  %v378_v30 = vld [vmem:[#allocation5 + $0xa10] sm:$0xff]  ;;  %v2176_v32 = vpack.c.bf16 %v323_v26, %v296_v25  ;;  %v68_v25 = vld [vmem:[#allocation5 + $0x60] sm:$0xff] }
 0x185   :  { %1895 = vmatprep.subr.bf16.mxu1 %v1894_v43  ;;  %2147 = vmatprep.subr.bf16.mxu0 %v2146_v44  ;;  %v594_v43 = vrot.slane %v2484_v36, %v2444_v8  ;;  %v650_v44 = vrot.slane %v2493_v55, %v2424_v47  ;;  %v1912_v8 = vpack.c.bf16 %v147_v46, %v120_v45  ;;  %v432_v45 = vld [vmem:[#allocation5 + $0xbc0] sm:$0xff]  ;;  %v95_v26 = vld [vmem:[#allocation5 + $0x138] sm:$0xff] }
 0x186   :  { %v1926_v34 = vpack.c.bf16 %v364_v28, %v337_v27  ;;  %v82_v27 = vld [vmem:[#allocation5 + $0xd0] sm:$0xff]  ;;  %v2360_v28 = vmov 0.0|0.0  }
 0x18c   :  { %1897 = vmatpush1.bf16.xpose.msra.mxu1 %v1896_v53  ;;  %2149 = vmatpush1.bf16.xpose.msra.mxu0 %v2148_v54  ;;  %v1914_v53 = vpack.c.bf16 %v202_v50, %v175_v49  ;;  %v2166_v54 = vpack.c.bf16 %v216_v51, %v189_v52  ;;  %v390_v50 = vld [vmem:[#allocation5 + $0xa70] sm:$0xff]  ;;  %v417_v52 = vld [vmem:[#allocation5 + $0xb48] sm:$0xff]  ;;  %v404_v51 = vld [vmem:[#allocation5 + $0xae0] sm:$0xff] }
 0x18d   :  { %1899 = vmatprep.subr.bf16.mxu1 %v1898_v56  ;;  %2151 = vmatprep.subr.bf16.mxu0 %v2150_v57  ;;  %v174_v56 = vld [vmem:[#allocation5 + $0x3b0] sm:$0xff]  ;;  %v201_v57 = vld [vmem:[#allocation5 + $0x488] sm:$0xff] }
 0x18e   :  { %v1916_v3 = vpack.c.bf16 %v201_v57, %v174_v56  ;;  %v486_v56 = vld [vmem:[#allocation5 + $0xd70] sm:$0xff]  ;;  %v1932_v57 = vpack.c.bf16 %v417_v52, %v390_v50  ;;  %v203_v52 = vld [vmem:[#allocation5 + $0x498] sm:$0xff] }
 0x194   :  { %1901 = vmatpush1.bf16.xpose.msra.mxu1 %v1900_v6  ;;  %2153 = vmatpush1.bf16.xpose.msra.mxu0 %v2152_v7  ;;  %v1918_v6 = vpack.c.bf16 %v256_v62, %v229_v61  ;;  %v2170_v7 = vpack.c.bf16 %v270_v2, %v243_v63  ;;  %v444_v62 = vld [vmem:[#allocation5 + $0xc20] sm:$0xff]  ;;  %v471_v63 = vld [vmem:[#allocation5 + $0xcf8] sm:$0xff]  ;;  %v458_v2 = vld [vmem:[#allocation5 + $0xc90] sm:$0xff] }
 0x195   :  { %1903 = vmatprep.subr.bf16.mxu1 %v1902_v9  ;;  %2155 = vmatprep.subr.bf16.mxu0 %v2154_v10  ;;  %v228_v9 = vld [vmem:[#allocation5 + $0x560] sm:$0xff]  ;;  %v255_v10 = vld [vmem:[#allocation5 + $0x638] sm:$0xff] }
 0x196   :  { %v1920_v20 = vpack.c.bf16 %v255_v10, %v228_v9  ;;  %v540_v9 = vld [vmem:[#allocation5 + $0xf20] sm:$0xff]  ;;  %v1936_v10 = vpack.c.bf16 %v471_v63, %v444_v62  ;;  %v271_v62 = vld [vmem:[#allocation5 + $0x6b8] sm:$0xff]  ;;  %v285_v63 = vld [vmem:[#allocation5 + $0x728] sm:$0xff] }
 0x19c   :  { %1905 = vmatpush1.bf16.xpose.msra.mxu1 %v1904_v22  ;;  %2157 = vmatpush1.bf16.xpose.msra.mxu0 %v2156_v59  ;;  %v1922_v22 = vpack.c.bf16 %v310_v17, %v283_v16  ;;  %v2174_v59 = vpack.c.bf16 %v324_v19, %v297_v18  ;;  %v498_v17 = vld [vmem:[#allocation5 + $0xdd0] sm:$0xff]  ;;  %v525_v18 = vld [vmem:[#allocation5 + $0xea8] sm:$0xff]  ;;  %v512_v19 = vld [vmem:[#allocation5 + $0xe40] sm:$0xff] }
 0x19d   :  { %1907 = vmatprep.subr.bf16.mxu1 %v1906_v23  ;;  %2159 = vmatprep.subr.bf16.mxu0 %v2158_v24  ;;  %v282_v23 = vld [vmem:[#allocation5 + $0x710] sm:$0xff]  ;;  %v309_v24 = vld [vmem:[#allocation5 + $0x7e8] sm:$0xff] }
 0x1a3   :  { %1042 = vmatmul.mubr.f32.vlgmr.msra.gmra.mrb[0].mxu1 %v582_v31  ;;  %1539 = vmatmul.mubr.f32.vlgmr.msra.gmra.mrb[0].mxu0 %v638_v38  ;;  %v1924_v31 = vpack.c.bf16 %v309_v24, %v282_v23  ;;  %v363_v38 = vld [vmem:[#allocation5 + $0x998] sm:$0xff] }
 0x1a4   :  { %1909 = vmatpush1.bf16.xpose.msra.mxu1 %v1908_v35  ;;  %2161 = vmatpush1.bf16.xpose.msra.mxu0 %v2160_v39  ;;  %v2178_v35 = vpack.c.bf16 %v378_v30, %v351_v29  ;;  %v350_v39 = vld [vmem:[#allocation5 + $0x930] sm:$0xff]  ;;  %v1928_v46 = vpack.c.bf16 %v363_v38, %v336_v37  ;;  %v109_v29 = vld [vmem:[#allocation5 + $0x1a8] sm:$0xff]  ;;  %v123_v30 = vld [vmem:[#allocation5 + $0x218] sm:$0xff] }
 0x1a5   :  { %1911 = vmatprep.subr.bf16.mxu1 %v1910_v40  ;;  %2163 = vmatprep.subr.bf16.mxu0 %v2162_v41  ;;  %v377_v40 = vld [vmem:[#allocation5 + $0xa08] sm:$0xff]  ;;  %v391_v41 = vld [vmem:[#allocation5 + $0xa78] sm:$0xff]  ;;  %v2195_v37 = vpack.c.bf16 %v109_v29, %v82_v27  ;;  %v392_v29 = vld [vmem:[#allocation5 + $0xa80] sm:$0xff] }
 0x1a6   :  { %1112 = vmatprep.mubr.f32.mxu1 %v594_v43  ;;  %1609 = vmatprep.mubr.f32.mxu0 %v650_v44  ;;  %v418_v43 = vld [vmem:[#allocation5 + $0xb50] sm:$0xff]  ;;  %v405_v44 = vld [vmem:[#allocation5 + $0xae8] sm:$0xff]  ;;  %v2180_v48 = vpack.c.bf16 %v377_v40, %v350_v39  ;;  %v602_v39 = vrot.slane %v2484_v36, %v2460_v12  ;;  %v176_v12 = vld [vmem:[#allocation5 + $0x3c0] sm:$0xff] }
 0x1a7   :  { %v1930_v1 = vpack.c.bf16 %v418_v43, %v391_v41  ;;  %v2182_v49 = vpack.c.bf16 %v432_v45, %v405_v44  ;;  %v122_v40 = vld [vmem:[#allocation5 + $0x210] sm:$0xff]  ;;  %v149_v41 = vld [vmem:[#allocation5 + $0x2e8] sm:$0xff]  ;;  %v136_v43 = vld [vmem:[#allocation5 + $0x280] sm:$0xff] }
 0x1a8   :  { %v163_v44 = vld [vmem:[#allocation5 + $0x358] sm:$0xff]  ;;  %v177_v45 = vld [vmem:[#allocation5 + $0x3c8] sm:$0xff] }
 0x1ac   :  { %1913 = vmatpush1.bf16.xpose.msra.mxu1 %v1912_v8  ;;  %2165 = vmatpush1.bf16.xpose.msra.mxu0 %v2164_v14  ;;  %v431_v8 = vld [vmem:[#allocation5 + $0xbb8] sm:$0xff]  ;;  %v445_v14 = vld [vmem:[#allocation5 + $0xc28] sm:$0xff] }
 0x1ad   :  { %1915 = vmatprep.subr.bf16.mxu1 %v1914_v53  ;;  %2167 = vmatprep.subr.bf16.mxu0 %v2166_v54  ;;  %v472_v53 = vld [vmem:[#allocation5 + $0xd00] sm:$0xff]  ;;  %v459_v54 = vld [vmem:[#allocation5 + $0xc98] sm:$0xff]  ;;  %v2184_v58 = vpack.c.bf16 %v431_v8, %v404_v51  ;;  %v190_v51 = vld [vmem:[#allocation5 + $0x430] sm:$0xff] }
 0x1ae   :  { %v1934_v60 = vpack.c.bf16 %v472_v53, %v445_v14  ;;  %v2186_v61 = vpack.c.bf16 %v486_v56, %v459_v54  ;;  %v217_v8 = vld [vmem:[#allocation5 + $0x508] sm:$0xff]  ;;  %v231_v14 = vld [vmem:[#allocation5 + $0x578] sm:$0xff]  ;;  %v258_v53 = vld [vmem:[#allocation5 + $0x650] sm:$0xff]  ;;  %v1952_v54 = vpack.c.bf16 %v203_v52, %v176_v12 }
 0x1af   :  { %v2201_v56 = vpack.c.bf16 %v217_v8, %v190_v51  ;;  %v527_v12 = vld [vmem:[#allocation5 + $0xeb8] sm:$0xff]  ;;  %v514_v52 = vld [vmem:[#allocation5 + $0xe50] sm:$0xff]  ;;  %v541_v51 = vld [vmem:[#allocation5 + $0xf28] sm:$0xff] }
 0x1b4   :  { %1917 = vmatpush1.bf16.xpose.msra.mxu1 %v1916_v3  ;;  %2169 = vmatpush1.bf16.xpose.msra.mxu0 %v2168_v5  ;;  %v485_v3 = vld [vmem:[#allocation5 + $0xd68] sm:$0xff]  ;;  %v499_v5 = vld [vmem:[#allocation5 + $0xdd8] sm:$0xff] }
 0x1b5   :  { %1919 = vmatprep.subr.bf16.mxu1 %v1918_v6  ;;  %2171 = vmatprep.subr.bf16.mxu0 %v2170_v7  ;;  %v526_v6 = vld [vmem:[#allocation5 + $0xeb0] sm:$0xff]  ;;  %v513_v7 = vld [vmem:[#allocation5 + $0xe48] sm:$0xff]  ;;  %v2188_v11 = vpack.c.bf16 %v485_v3, %v458_v2  ;;  %v312_v2 = vld [vmem:[#allocation5 + $0x800] sm:$0xff] }
 0x1b6   :  { %v1938_v15 = vpack.c.bf16 %v526_v6, %v499_v5  ;;  %v2190_v16 = vpack.c.bf16 %v540_v9, %v513_v7  ;;  %v1958_v6 = vpack.c.bf16 %v312_v2, %v285_v63  ;;  %v284_v7 = vld [vmem:[#allocation5 + $0x720] sm:$0xff]  ;;  %v311_v9 = vld [vmem:[#allocation5 + $0x7f8] sm:$0xff] }
 0x1bc   :  { %1921 = vmatpush1.bf16.xpose.msra.mxu1 %v1920_v20  ;;  %2173 = vmatpush1.bf16.xpose.msra.mxu0 %v2172_v21  ;;  %v539_v20 = vld [vmem:[#allocation5 + $0xf18] sm:$0xff]  ;;  %v69_v21 = vld [vmem:[#allocation5 + $0x68] sm:$0xff] }
 0x1bd   :  { %1923 = vmatprep.subr.bf16.mxu1 %v1922_v22  ;;  %2175 = vmatprep.subr.bf16.mxu0 %v2174_v59  ;;  %v96_v22 = vld [vmem:[#allocation5 + $0x140] sm:$0xff]  ;;  %v1940_v59 = vpack.c.bf16 %v525_v18, %v498_v17  ;;  %v2192_v23 = vpack.c.bf16 %v539_v20, %v512_v19  ;;  %v1960_v17 = vpack.c.bf16 %v311_v9, %v284_v7  ;;  %v338_v20 = vld [vmem:[#allocation5 + $0x8d0] sm:$0xff] }
 0x1be   :  { %v1942_v24 = vpack.c.bf16 %v96_v22, %v69_v21  ;;  %v365_v21 = vld [vmem:[#allocation5 + $0x9a8] sm:$0xff]  ;;  %v352_v22 = vld [vmem:[#allocation5 + $0x940] sm:$0xff] }
 0x1c4   :  { %1925 = vmatpush1.bf16.xpose.msra.mxu1 %v1924_v31  ;;  %2177 = vmatpush1.bf16.xpose.msra.mxu0 %v2176_v32  ;;  %v150_v31 = vld [vmem:[#allocation5 + $0x2f0] sm:$0xff]  ;;  %v590_v32 = vrot.slane %v2484_v36, %v2457_v4 }
 0x1c5   :  { %1927 = vmatprep.subr.bf16.mxu1 %v1926_v34  ;;  %2179 = vmatprep.subr.bf16.mxu0 %v2178_v35  ;;  %v1944_v34 = vpack.c.bf16 %v95_v26, %v68_v25  ;;  %v646_v35 = vrot.slane %v2493_v55, %v2438_v0  ;;  %v1946_v38 = vpack.c.bf16 %v150_v31, %v123_v30  ;;  %v419_v30 = vld [vmem:[#allocation5 + $0xb58] sm:$0xff]  ;;  %v406_v31 = vld [vmem:[#allocation5 + $0xaf0] sm:$0xff] }
 0x1c6   :  { %v1964_v25 = vpack.c.bf16 %v365_v21, %v338_v20 }
 0x1cc   :  { %1929 = vmatpush1.bf16.xpose.msra.mxu1 %v1928_v46  ;;  %2181 = vmatpush1.bf16.xpose.msra.mxu0 %v2180_v48  ;;  %v204_v46 = vld [vmem:[#allocation5 + $0x4a0] sm:$0xff]  ;;  %v2361_v48 = vmov 0.0  }
 0x1cd   :  { %1931 = vmatprep.subr.bf16.mxu1 %v1930_v1  ;;  %2183 = vmatprep.subr.bf16.mxu0 %v2182_v49  ;;  %v1948_v1 = vpack.c.bf16 %v149_v41, %v122_v40  ;;  %v2198_v49 = vpack.c.bf16 %v163_v44, %v136_v43  ;;  %v1950_v50 = vpack.c.bf16 %v204_v46, %v177_v45  ;;  %v446_v40 = vld [vmem:[#allocation5 + $0xc30] sm:$0xff]  ;;  %v473_v41 = vld [vmem:[#allocation5 + $0xd08] sm:$0xff]  ;;  %v460_v43 = vld [vmem:[#allocation5 + $0xca0] sm:$0xff] }
 0x1ce   :  { %v487_v44 = vld [vmem:[#allocation5 + $0xd78] sm:$0xff]  ;;  %v501_v45 = vld [vmem:[#allocation5 + $0xde8] sm:$0xff]  ;;  %v528_v46 = vld [vmem:[#allocation5 + $0xec0] sm:$0xff] }
 0x1d4   :  { %1933 = vmatpush1.bf16.xpose.msra.mxu1 %v1932_v57  ;;  %2185 = vmatpush1.bf16.xpose.msra.mxu0 %v2184_v58  ;;  %v1954_v57 = vpack.c.bf16 %v258_v53, %v231_v14  ;;  %v230_v58 = vld [vmem:[#allocation5 + $0x570] sm:$0xff]  ;;  %v2219_v14 = vpack.c.bf16 %v541_v51, %v514_v52  ;;  %v598_v53 = vrot.slane %v2484_v36, %v2471_v13 }
 0x1d5   :  { %1935 = vmatprep.subr.bf16.mxu1 %v1934_v60  ;;  %2187 = vmatprep.subr.bf16.mxu0 %v2186_v61  ;;  %v257_v60 = vld [vmem:[#allocation5 + $0x648] sm:$0xff]  ;;  %v244_v61 = vld [vmem:[#allocation5 + $0x5e0] sm:$0xff] }
 0x1d6   :  { %v1956_v3 = vpack.c.bf16 %v257_v60, %v230_v58  ;;  %v2204_v5 = vpack.c.bf16 %v271_v62, %v244_v61 }
 0x1dc   :  { %1937 = vmatpush1.bf16.xpose.msra.mxu1 %v1936_v10  ;;  %2189 = vmatpush1.bf16.xpose.msra.mxu0 %v2188_v11  ;;  %v298_v10 = vld [vmem:[#allocation5 + $0x790] sm:$0xff]  ;;  %v325_v11 = vld [vmem:[#allocation5 + $0x868] sm:$0xff] }
 0x1dd   :  { %1939 = vmatprep.subr.bf16.mxu1 %v1938_v15  ;;  %2191 = vmatprep.subr.bf16.mxu0 %v2190_v16  ;;  %v339_v15 = vld [vmem:[#allocation5 + $0x8d8] sm:$0xff]  ;;  %v366_v16 = vld [vmem:[#allocation5 + $0x9b0] sm:$0xff]  ;;  %v2207_v18 = vpack.c.bf16 %v325_v11, %v298_v10 }
 0x1de   :  { %v1962_v19 = vpack.c.bf16 %v366_v16, %v339_v15 }
 0x1e4   :  { %1941 = vmatpush1.bf16.xpose.msra.mxu1 %v1940_v59  ;;  %2193 = vmatpush1.bf16.xpose.msra.mxu0 %v2192_v23  ;;  %v379_v59 = vld [vmem:[#allocation5 + $0xa18] sm:$0xff]  ;;  %v393_v23 = vld [vmem:[#allocation5 + $0xa88] sm:$0xff] }
 0x1e5   :  { %1943 = vmatprep.subr.bf16.mxu1 %v1942_v24  ;;  %2194 = vmatprep.subr.bf16.mxu0 %v2360_v28  ;;  %v420_v24 = vld [vmem:[#allocation5 + $0xb60] sm:$0xff]  ;;  %v2210_v26 = vpack.c.bf16 %v379_v59, %v352_v22 }
 0x1e6   :  { %v1966_v27 = vpack.c.bf16 %v420_v24, %v393_v23 }
 0x1eb   :  { %1113 = vmatmul.mubr.f32.vlgmr.msra.gmra.mrb[0].mxu1 %v590_v32  ;;  %1610 = vmatmul.mubr.f32.vlgmr.msra.gmra.mrb[0].mxu0 %v646_v35  ;;  %v433_v32 = vld [vmem:[#allocation5 + $0xbc8] sm:$0xff]  ;;  %v474_v35 = vld [vmem:[#allocation5 + $0xd10] sm:$0xff] }
 0x1ec   :  { %1945 = vmatpush1.bf16.xpose.msra.mxu1 %v1944_v34  ;;  %2196 = vmatpush1.bf16.xpose.msra.mxu0 %v2195_v37  ;;  %v447_v34 = vld [vmem:[#allocation5 + $0xc38] sm:$0xff]  ;;  %v1968_v37 = vpack.c.bf16 %v419_v30, %v392_v29 }
 0x1ed   :  { %1947 = vmatprep.subr.bf16.mxu1 %v1946_v38  ;;  %2197 = vmatprep.subr.bf16.mxu0 %v2360_v28  ;;  %v2213_v38 = vpack.c.bf16 %v433_v32, %v406_v31 }
 0x1ee   :  { %1183 = vmatprep.mubr.f32.mxu1 %v602_v39  ;;  %1680 = vmatprep.mubr.f32.mxu0 %v2361_v48  ;;  %v1970_v39 = vpack.c.bf16 %v474_v35, %v447_v34  ;;  %v1972_v48 = vpack.c.bf16 %v473_v41, %v446_v40 }
 0x1f4   :  { %1949 = vmatpush1.bf16.xpose.msra.mxu1 %v1948_v1  ;;  %2199 = vmatpush1.bf16.xpose.msra.mxu0 %v2198_v49  ;;  %v2216_v1 = vpack.c.bf16 %v487_v44, %v460_v43  ;;  %v1974_v49 = vpack.c.bf16 %v528_v46, %v501_v45 }
 0x1f5   :  { %1951 = vmatprep.subr.bf16.mxu1 %v1950_v50  ;;  %2200 = vmatprep.subr.bf16.mxu0 %v2360_v28  ;;  %v500_v50 = vld [vmem:[#allocation5 + $0xde0] sm:$0xff] }
 0x1f6   :  { %v1976_v8 = vpack.c.bf16 %v527_v12, %v500_v50 }
 0x1fc   :  { %1953 = vmatpush1.bf16.xpose.msra.mxu1 %v1952_v54  ;;  %2202 = vmatpush1.bf16.xpose.msra.mxu0 %v2201_v56  ;;  %v654_v54 = vrot.slane %v2493_v55, %v2457_v4  ;;  %v542_v56 = vld [vmem:[#allocation7] sm:$0x3] }
 0x1fd   :  { %1955 = vmatprep.subr.bf16.mxu1 %v1954_v57  ;;  %2203 = vmatprep.subr.bf16.mxu0 %v2360_v28  ;;  %v2362_v57 = vmov 1966171168   ;;  %v686_v60 = vrot.slane %v542_v56, %v2438_v0 }
 0x1fe   :  { %v1691_v58 = vunpack.c.l.s4 %v2362_v57 }
 0x200   :  { %v1692_v62 = vunpack.c.0.s8 %v1691_v58 }
 0x202   :  { %v1695_v4 = vsub.s32 %v1692_v62, %v2421_v42 }
 0x204   :  { %1957 = vmatpush1.bf16.xpose.msra.mxu1 %v1956_v3  ;;  %2205 = vmatpush1.bf16.xpose.msra.mxu0 %v2204_v5 }
 0x205   :  { %1959 = vmatprep.subr.bf16.mxu1 %v1958_v6  ;;  %2206 = vmatprep.subr.bf16.mxu0 %v2360_v28 }
 0x20c   :  { %1961 = vmatpush1.bf16.xpose.msra.mxu1 %v1960_v17  ;;  %2208 = vmatpush1.bf16.xpose.msra.mxu0 %v2207_v18 }
 0x20d   :  { %1963 = vmatprep.subr.bf16.mxu1 %v1962_v19  ;;  %2209 = vmatprep.subr.bf16.mxu0 %v2360_v28 }
 0x214   :  { %1965 = vmatpush1.bf16.xpose.msra.mxu1 %v1964_v25  ;;  %2211 = vmatpush1.bf16.xpose.msra.mxu0 %v2210_v26 }
 0x215   :  { %1967 = vmatprep.subr.bf16.mxu1 %v1966_v27  ;;  %2212 = vmatprep.subr.bf16.mxu0 %v2360_v28 }
 0x21c   :  { %1969 = vmatpush1.bf16.xpose.msra.mxu1 %v1968_v37  ;;  %2214 = vmatpush1.bf16.xpose.msra.mxu0 %v2213_v38 }
 0x21d   :  { %1971 = vmatprep.subr.bf16.mxu1 %v1970_v39  ;;  %2215 = vmatprep.subr.bf16.mxu0 %v2360_v28 }
 0x224   :  { %1973 = vmatpush1.bf16.xpose.msra.mxu1 %v1972_v48  ;;  %2217 = vmatpush1.bf16.xpose.msra.mxu0 %v2216_v1 }
 0x225   :  { %1975 = vmatprep.subr.bf16.mxu1 %v1974_v49  ;;  %2218 = vmatprep.subr.bf16.mxu0 %v2360_v28  ;;  %v690_v28 = vrot.slane %v542_v56, %v2424_v47 }
 0x22c   :  { %1977 = vmatpush1.bf16.xpose.msra.mxu1 %v1976_v8  ;;  %2220 = vmatpush1.bf16.xpose.msra.mxu0 %v2219_v14 }
 0x233   :  { %1184 = vmatmul.mubr.f32.vlgmr.msra.gmra.mrb[0].mxu1 %v598_v53  ;;  %1681 = vmatmul.mubr.f32.vlgmr.msra.gmra.mrb[0].mxu0 %v654_v54 }
 0x306   :  { %v1185_v61 = vpop.f32.mrb[0].mxu1  ;;  %v1682_v2 = vpop.f32.mrb[0].mxu0 }
 0x307   :  { %v2221_v63 = vadd.f32 %v1185_v61, %v686_v60  ;;  %v1187_v3 = vpop.f32.mrb[1].mxu1  ;;  %v1684_v6 = vpop.f32.mrb[1].mxu0 }
 0x308   :  { %v2223_v5 = vadd.f32 %v1187_v3, %v690_v28 }
 0x309   :  { %v2222_v13 = vadd.f32 %v2221_v63, %v1682_v2 }
 0x30a   :  { %v2224_v36 = vadd.f32 %v2223_v5, %v1684_v6 }
 0x30c   :  { %v1689_v55 = vcombine.low %v2222_v13, %v2224_v36 }
 0x30e   :  { %v1696_v7 = vrot.slane %v1689_v55, %v1695_v4 }
 0x310   :  { %v1703_v0 = vrot.slane %v1696_v7, %v1695_v4 }
 0x312   :  { %1709 = vst.msk [vmem:[#allocation8] sm:$0x3] %vm1707_vm0, %v1703_v0 }
 0x313   :  { %2338 = shalt.err (!%p2335_p0)
}
 0x314   :  { %s2339_s26 = scalar_lea.hbm %s2537_s3, 32 }
 0x315   :  { %p2340_p1 = scmp.ne.s32.totalorder %s2537_s3, %s2339_s26  ;;  %p2343_p2 = scmp.lt.u32.totalorder %s2339_s26, %s2537_s3 }
 0x317   :  { %p2345_p3 = pnand %p2343_p2, %p2340_p1 }
 0x319   :  { %2348 = shalt.err (!%p2345_p3)
}
 0x31a   :  { %1719 = dma.vmem_to_hbm [thread:$0]  %s1717_s22, 32, %s2537_s3, [#allocation4]  }
 0x31b   :  { %2353 = dma.done.wait [#allocation4], 32  }
 0x31c   :  { %2354 = vsyncadd [#allocation4], 4294967264 }
 0x31d   :  { %1723 = vsyncpa [#allocation3], 1 }
 0x31e   :  { %1724 = vsyncpa [#allocation6], 1 }
 0x31f   :  { %1725 = vsyncpa [#allocation4], 1 }

</bundles_post_ra>
